<compile_context>
chip_gen: v7x
topology: tpu7x:2x2x1
jax: 0.10.0
libtpu: 0.0.40
codegen_flags: <defaults>
</compile_context>

<pallas_src>
import math
import functools

import jax
import jax.numpy as jnp
from jax.experimental import pallas as pl
from jax.experimental.pallas import tpu as pltpu


# ----------------------------------------------------------------------------
# Fused kernel: projections + per-head attention + out-proj + residual + BN.
# ----------------------------------------------------------------------------
def _mha_bn_kernel(q_ref, k_ref, v_ref,
                   wq_ref, wk_ref, wv_ref,
                   bq_ref, bk_ref, bv_ref,
                   wo_ref, bo_ref,
                   gamma_ref, beta_ref,
                   o_ref, ctx_ref,
                   *, batch, n_heads, head_dim, seq_q, seq_kv, eps,
                   compute_dtype):
    f32 = jnp.float32
    cd = compute_dtype
    approx = jnp.dtype(cd) != jnp.dtype(jnp.float32)

    # Lane-dense channel-first activations: q (E, B*L), k/v (E, B*S).
    q_raw = q_ref[...]
    xq = q_raw.astype(f32)                       # residual path stays f32

    # Input projections: x_seq @ W^T + b  ==  W @ x_cf + b[:, None].
    # One full-K (K = E) matmul each, covering every batch at once.
    # 1/sqrt(head_dim) is already folded into wq / bq on the parameter side.
    q_p = jnp.dot(wq_ref[...], q_raw.astype(cd),
                  preferred_element_type=f32) + bq_ref[...]
    k_p = jnp.dot(wk_ref[...], k_ref[...].astype(cd),
                  preferred_element_type=f32) + bk_ref[...]
    v_p = jnp.dot(wv_ref[...], v_ref[...].astype(cd),
                  preferred_element_type=f32) + bv_ref[...]

    # Per-(batch, head) attention.  Outputs are written directly into the
    # preallocated VMEM scratch slab ctx_ref (E, B*L) — no list/concat, live
    # ranges bounded per iteration — laid out so the output projection below
    # is a single full-K matmul.  All slices are taken from f32 tensors
    # (sublane-aligned at head_dim granularity), and the tiny K=head_dim / K=S
    # matmuls stay in f32 (latency-bound, not MXU-bound at these widths).
    for b in range(batch):
        c0 = b * seq_q
        d0 = b * seq_kv
        q_b = q_p[:, c0:c0 + seq_q]              # (E, L)
        k_b = k_p[:, d0:d0 + seq_kv]             # (E, S)
        v_b = v_p[:, d0:d0 + seq_kv]             # (E, S)
        for h in range(n_heads):
            r0 = h * head_dim
            qh = q_b[r0:r0 + head_dim, :]        # (d, L)
            kh = k_b[r0:r0 + head_dim, :]        # (d, S)
            vh = v_b[r0:r0 + head_dim, :]        # (d, S)

            # s[l, s] = sum_d qh[d, l] * kh[d, s]  (contract axis 0 of both —
            # no transposes; the MXU takes the transposed-LHS form natively).
            s = jax.lax.dot_general(
                qh, kh, dimension_numbers=(((0,), (0,)), ((), ())),
                preferred_element_type=f32)      # (L, S)
            m = jnp.max(s, axis=-1, keepdims=True)
            p = jnp.exp(s - m)
            denom = jnp.sum(p, axis=-1, keepdims=True)
            p = p * pl.reciprocal(denom, approx=approx)   # EUP, no VALU divide
            # TODO(synk): attn_mask / key_padding_mask / attention dropout not
            #             implemented (module exercised with dropout=0, None).

            # oh[e, l] = sum_s vh[e, s] * p[l, s]  -> (d, L), channel-first.
            oh = jax.lax.dot_general(
                vh, p, dimension_numbers=(((1,), (1,)), ((), ())),
                preferred_element_type=f32)
            ctx_ref[r0:r0 + head_dim, c0:c0 + seq_q] = oh

    # Output projection (single full-K matmul) + bias, then residual add.
    y = jnp.dot(wo_ref[...], ctx_ref[...].astype(cd),
                preferred_element_type=f32) + bo_ref[...]
    r = xq + y                                   # (E, B*L) f32

    # BatchNorm1d, training-mode (biased) statistics per channel over
    # (batch, seq), single pass (sum + sum-of-squares); affine folded into one
    # scale/shift FMA.
    inv_n = 1.0 / float(r.shape[1])
    s1 = jnp.sum(r, axis=1, keepdims=True)
    s2 = jnp.sum(r * r, axis=1, keepdims=True)
    mean = s1 * inv_n
    var = jnp.maximum(s2 * inv_n - mean * mean, 0.0)
    a = jax.lax.rsqrt(var + eps) * gamma_ref[...]
    c = beta_ref[...] - mean * a

    # Lane-dense (E, B*L) store — no per-batch masked narrow-lane writes.
    o_ref[...] = r * a + c
    # TODO(synk): BatchNorm running_mean / running_var updates not produced.


# ----------------------------------------------------------------------------
# Wrapper
# ----------------------------------------------------------------------------
def mha_forward(q, k, v, params, *, n_heads, eps=1e-5,
                compute_dtype=jnp.bfloat16, input_dtype=jnp.float32):
    """q: [B, E, L]; k, v: [B, E, S] -> [B, E, L] (float32).

    compute_dtype: MXU operand dtype for the 4 projection matmuls (f32 accum).
    input_dtype:   HBM activation dtype (bf16 halves activation traffic on
                   v5e's narrower HBM; residual/softmax/BN math stays f32).
    """
    B, E, L = q.shape
    S = k.shape[2]
    head_dim = E // n_heads
    cd = compute_dtype
    f32 = jnp.float32

    # Lane-dense channel-first slabs: [B, E, L] -> [E, B*L].  Wrapper-side
    # layout plumbing (one XLA copy) so the kernel needs no in-kernel batch
    # folding and all input/output DMA tiles are as lane-dense as possible.
    def fold(x):
        Ex = x.shape[1]
        return jnp.transpose(x, (1, 0, 2)).reshape(Ex, -1).astype(input_dtype)

    q_cf, k_cf, v_cf = fold(q), fold(k), fold(v)

    # Weights are consumed un-transposed (left-multiplied) by the kernel.  The
    # PyTorch 1/sqrt(head_dim) query scaling is folded into wq / bq once here
    # (E x E, parameter-side) instead of scaling the whole projected q per call.
    scale = 1.0 / math.sqrt(head_dim)
    wq = (params["wq"] * scale).astype(cd)
    wk = params["wk"].astype(cd)
    wv = params["wv"].astype(cd)
    wo = params["wo"].astype(cd)
    bq = (params["bq"] * scale).reshape(E, 1).astype(f32)
    bk = params["bk"].reshape(E, 1).astype(f32)
    bv = params["bv"].reshape(E, 1).astype(f32)
    bo = params["bo"].reshape(E, 1).astype(f32)
    gamma = params["gamma"].reshape(E, 1).astype(f32)
    beta = params["beta"].reshape(E, 1).astype(f32)

    kernel = functools.partial(
        _mha_bn_kernel, batch=B, n_heads=n_heads, head_dim=head_dim,
        seq_q=L, seq_kv=S, eps=eps, compute_dtype=cd)

    # Single invocation (no grid): the whole problem fits easily in VMEM at
    # these shapes.  TODO(synk): for large B/L/S, switch to an L-tiled grid
    # ("parallel" axis for v7x's 2 TensorCores) with flash-style S streaming
    # and a two-pass BatchNorm epilogue, and raise vmem_limit_bytes to pick the
    # largest double-buffered tile that fits.
    out_cf = pl.pallas_call(
        kernel,
        out_shape=jax.ShapeDtypeStruct((E, B * L), f32),
        scratch_shapes=[pltpu.VMEM((E, B * L), f32)],
        compiler_params=pltpu.CompilerParams(
            vmem_limit_bytes=32 * 1024 * 1024),
    )(q_cf, k_cf, v_cf, wq, wk, wv, bq, bk, bv, wo, bo, gamma, beta)

    # Back to the module's [B, E, L] layout (wrapper-side layout plumbing).
    return jnp.transpose(out_cf.reshape(E, B, L), (1, 0, 2))


# ----------------------------------------------------------------------------
# Pure-JAX f32 reference (mirrors torch.nn.MultiheadAttention + BatchNorm1d)
# ----------------------------------------------------------------------------
def reference_forward(q, k, v, params, *, n_heads, eps=1e-5):
    B, E, L = q.shape
    d = E // n_heads
    qt = jnp.swapaxes(q, 1, 2)
    kt = jnp.swapaxes(k, 1, 2)
    vt = jnp.swapaxes(v, 1, 2)
    Q = qt @ params["wq"].T + params["bq"]
    K = kt @ params["wk"].T + params["bk"]
    V = vt @ params["wv"].T + params["bv"]

    def split(x):
        Bx, Lx, _ = x.shape
        return x.reshape(Bx, Lx, n_heads, d).transpose(0, 2, 1, 3)

    Qh, Kh, Vh = split(Q), split(K), split(V)
    s = jnp.einsum("bhld,bhsd->bhls", Qh, Kh) / math.sqrt(d)
    p = jax.nn.softmax(s, axis=-1)
    o = jnp.einsum("bhls,bhsd->bhld", p, Vh)
    o = o.transpose(0, 2, 1, 3).reshape(B, L, E)
    y = o @ params["wo"].T + params["bo"]
    r = qt + y
    mean = r.mean(axis=(0, 1), keepdims=True)
    var = jnp.square(r - mean).mean(axis=(0, 1), keepdims=True)
    out = (r - mean) / jnp.sqrt(var + eps) * params["gamma"] + params["beta"]
    return jnp.swapaxes(out, 1, 2)


if __name__ == "__main__":
    B, E, L, S = 2, 32, 16, 8
    n_heads = 4

    key = jax.random.PRNGKey(0)
    ks = jax.random.split(key, 12)

    # Deterministic synthetic parameters (shapes match nn.MultiheadAttention(E,H)
    # in_proj_weight split into wq/wk/wv, out_proj, and BatchNorm1d affine).
    params = {
        "wq": 0.1 * jax.random.normal(ks[0], (E, E), jnp.float32),
        "wk": 0.1 * jax.random.normal(ks[1], (E, E), jnp.float32),
        "wv": 0.1 * jax.random.normal(ks[2], (E, E), jnp.float32),
        "bq": 0.05 * jax.random.normal(ks[3], (E,), jnp.float32),
        "bk": 0.05 * jax.random.normal(ks[4], (E,), jnp.float32),
        "bv": 0.05 * jax.random.normal(ks[5], (E,), jnp.float32),
        "wo": 0.1 * jax.random.normal(ks[6], (E, E), jnp.float32),
        "bo": 0.05 * jax.random.normal(ks[7], (E,), jnp.float32),
        "gamma": 1.0 + 0.1 * jax.random.normal(ks[8], (E,), jnp.float32),
        "beta": 0.1 * jax.random.normal(ks[9], (E,), jnp.float32),
    }

    q = jax.random.normal(ks[10], (B, E, L), jnp.float32)
    kv_key0, kv_key1 = jax.random.split(ks[11])
    k = jax.random.normal(kv_key0, (B, E, S), jnp.float32)
    v = jax.random.normal(kv_key1, (B, E, S), jnp.float32)

    ref = reference_forward(q, k, v, params, n_heads=n_heads)

    # Full-precision path: same math as PyTorch, tight tolerance.
    out_f32 = mha_forward(q, k, v, params, n_heads=n_heads,
                          compute_dtype=jnp.float32,
                          input_dtype=jnp.float32)
    out_f32 = jax.block_until_ready(out_f32)
    assert out_f32.shape == (B, E, L)
    assert jnp.allclose(out_f32, ref, rtol=1e-4, atol=1e-4), (
        f"f32 max abs err = {jnp.max(jnp.abs(out_f32 - ref))}")

    # Default path: bf16 activations + bf16 MXU operands, f32 accumulation /
    # softmax / BatchNorm (softmax uses approx EUP reciprocal; rows sum to ~1).
    out_bf16 = mha_forward(q, k, v, params, n_heads=n_heads,
                           compute_dtype=jnp.bfloat16,
                           input_dtype=jnp.bfloat16)
    out_bf16 = jax.block_until_ready(out_bf16)
    assert out_bf16.shape == (B, E, L)
    assert jnp.allclose(out_bf16, ref, rtol=1e-1, atol=1e-1), (
        f"bf16 max abs err = {jnp.max(jnp.abs(out_bf16 - ref))}")

    print("KERNEL_OK")
</pallas_src>

<mosaic_0001>
module attributes {stable_mosaic.version = 11 : i64} {
  func.func @_mha_bn_kernel(%arg0: memref<32x32xf32, #tpu.memory_space<vmem>>, %arg1: memref<32x16xf32, #tpu.memory_space<vmem>>, %arg2: memref<32x16xf32, #tpu.memory_space<vmem>>, %arg3: memref<32x32xf32, #tpu.memory_space<vmem>>, %arg4: memref<32x32xf32, #tpu.memory_space<vmem>>, %arg5: memref<32x32xf32, #tpu.memory_space<vmem>>, %arg6: memref<32x1xf32, #tpu.memory_space<vmem>>, %arg7: memref<32x1xf32, #tpu.memory_space<vmem>>, %arg8: memref<32x1xf32, #tpu.memory_space<vmem>>, %arg9: memref<32x32xf32, #tpu.memory_space<vmem>>, %arg10: memref<32x1xf32, #tpu.memory_space<vmem>>, %arg11: memref<32x1xf32, #tpu.memory_space<vmem>>, %arg12: memref<32x1xf32, #tpu.memory_space<vmem>>, %arg13: memref<32x32xf32, #tpu.memory_space<vmem>>, %arg14: memref<32x32xf32, #tpu.memory_space<vmem>>) attributes {dimension_semantics = [], scalar_prefetch = 0 : i64, scratch_operands = 1 : i64, tpu.core_type = #tpu.core_type<tc>} {
    %c0 = arith.constant 0 : index
    %c0_0 = arith.constant 0 : index
    %0 = vector.load %arg0[%c0, %c0_0] : memref<32x32xf32, #tpu.memory_space<vmem>>, vector<32x32xf32>
    %c0_1 = arith.constant 0 : index
    %c0_2 = arith.constant 0 : index
    %1 = vector.load %arg3[%c0_1, %c0_2] : memref<32x32xf32, #tpu.memory_space<vmem>>, vector<32x32xf32>
    %cst = arith.constant dense<0.000000e+00> : vector<32x32xf32>
    %2 = tpu.matmul %1, %0, %cst {dimension_numbers = #tpu.dot_dimension_numbers<[1], [0], [0], [1], [0, 0, 1, 1], [], []>} : vector<32x32xf32>, vector<32x32xf32>, vector<32x32xf32> -> vector<32x32xf32>
    %c0_3 = arith.constant 0 : index
    %c0_4 = arith.constant 0 : index
    %3 = vector.load %arg6[%c0_3, %c0_4] : memref<32x1xf32, #tpu.memory_space<vmem>>, vector<32x1xf32>
    %4 = vector.broadcast %3 : vector<32x1xf32> to vector<32x32xf32>
    %5 = arith.addf %2, %4 : vector<32x32xf32>
    %c0_5 = arith.constant 0 : index
    %c0_6 = arith.constant 0 : index
    %6 = vector.load %arg4[%c0_5, %c0_6] : memref<32x32xf32, #tpu.memory_space<vmem>>, vector<32x32xf32>
    %c0_7 = arith.constant 0 : index
    %c0_8 = arith.constant 0 : index
    %7 = vector.load %arg1[%c0_7, %c0_8] : memref<32x16xf32, #tpu.memory_space<vmem>>, vector<32x16xf32>
    %cst_9 = arith.constant dense<0.000000e+00> : vector<32x16xf32>
    %8 = tpu.matmul %6, %7, %cst_9 {dimension_numbers = #tpu.dot_dimension_numbers<[1], [0], [0], [1], [0, 0, 1, 1], [], []>} : vector<32x32xf32>, vector<32x16xf32>, vector<32x16xf32> -> vector<32x16xf32>
    %c0_10 = arith.constant 0 : index
    %c0_11 = arith.constant 0 : index
    %9 = vector.load %arg7[%c0_10, %c0_11] : memref<32x1xf32, #tpu.memory_space<vmem>>, vector<32x1xf32>
    %10 = vector.broadcast %9 : vector<32x1xf32> to vector<32x16xf32>
    %11 = arith.addf %8, %10 : vector<32x16xf32>
    %c0_12 = arith.constant 0 : index
    %c0_13 = arith.constant 0 : index
    %12 = vector.load %arg5[%c0_12, %c0_13] : memref<32x32xf32, #tpu.memory_space<vmem>>, vector<32x32xf32>
    %c0_14 = arith.constant 0 : index
    %c0_15 = arith.constant 0 : index
    %13 = vector.load %arg2[%c0_14, %c0_15] : memref<32x16xf32, #tpu.memory_space<vmem>>, vector<32x16xf32>
    %cst_16 = arith.constant dense<0.000000e+00> : vector<32x16xf32>
    %14 = tpu.matmul %12, %13, %cst_16 {dimension_numbers = #tpu.dot_dimension_numbers<[1], [0], [0], [1], [0, 0, 1, 1], [], []>} : vector<32x32xf32>, vector<32x16xf32>, vector<32x16xf32> -> vector<32x16xf32>
    %c0_17 = arith.constant 0 : index
    %c0_18 = arith.constant 0 : index
    %15 = vector.load %arg8[%c0_17, %c0_18] : memref<32x1xf32, #tpu.memory_space<vmem>>, vector<32x1xf32>
    %16 = vector.broadcast %15 : vector<32x1xf32> to vector<32x16xf32>
    %17 = arith.addf %14, %16 : vector<32x16xf32>
    %18 = vector.extract_strided_slice %5 {offsets = [0, 0], sizes = [32, 16], strides = [1, 1]} : vector<32x32xf32> to vector<32x16xf32>
    %19 = vector.extract_strided_slice %11 {offsets = [0, 0], sizes = [32, 8], strides = [1, 1]} : vector<32x16xf32> to vector<32x8xf32>
    %20 = vector.extract_strided_slice %17 {offsets = [0, 0], sizes = [32, 8], strides = [1, 1]} : vector<32x16xf32> to vector<32x8xf32>
    %21 = vector.extract_strided_slice %18 {offsets = [0, 0], sizes = [8, 16], strides = [1, 1]} : vector<32x16xf32> to vector<8x16xf32>
    %22 = vector.extract_strided_slice %19 {offsets = [0, 0], sizes = [8, 8], strides = [1, 1]} : vector<32x8xf32> to vector<8x8xf32>
    %23 = vector.extract_strided_slice %20 {offsets = [0, 0], sizes = [8, 8], strides = [1, 1]} : vector<32x8xf32> to vector<8x8xf32>
    %cst_19 = arith.constant dense<0.000000e+00> : vector<16x8xf32>
    %24 = tpu.matmul %21, %22, %cst_19 {dimension_numbers = #tpu.dot_dimension_numbers<[0], [0], [1], [1], [0, 1, 1, 1], [], []>} : vector<8x16xf32>, vector<8x8xf32>, vector<16x8xf32> -> vector<16x8xf32>
    %cst_20 = arith.constant dense<0xFF800000> : vector<16xf32>
    %25 = vector.multi_reduction <maximumf>, %24, %cst_20 [1] : vector<16x8xf32> to vector<16xf32>
    %26 = vector.shape_cast %25 : vector<16xf32> to vector<16x1xf32>
    %27 = vector.broadcast %26 : vector<16x1xf32> to vector<16x8xf32>
    %28 = arith.subf %24, %27 : vector<16x8xf32>
    %29 = math.exp %28 : vector<16x8xf32>
    %cst_21 = arith.constant dense<0.000000e+00> : vector<16xf32>
    %30 = vector.multi_reduction <add>, %29, %cst_21 [1] : vector<16x8xf32> to vector<16xf32>
    %31 = vector.shape_cast %30 : vector<16xf32> to vector<16x1xf32>
    %32 = tpu.reciprocal %31 : vector<16x1xf32> -> vector<16x1xf32>
    %33 = vector.broadcast %32 : vector<16x1xf32> to vector<16x8xf32>
    %34 = arith.mulf %29, %33 : vector<16x8xf32>
    %cst_22 = arith.constant dense<0.000000e+00> : vector<8x16xf32>
    %35 = tpu.matmul %23, %34, %cst_22 {dimension_numbers = #tpu.dot_dimension_numbers<[1], [1], [0], [0], [0, 0, 1, 0], [], []>} : vector<8x8xf32>, vector<16x8xf32>, vector<8x16xf32> -> vector<8x16xf32>
    %c0_23 = arith.constant 0 : index
    %c0_24 = arith.constant 0 : index
    %36 = vector.load %arg14[%c0_23, %c0_24] : memref<32x32xf32, #tpu.memory_space<vmem>>, vector<8x16xf32>
    tpu.vector_store %arg14[%c0_23, %c0_24], %35 {strides = array<i32>} : memref<32x32xf32, #tpu.memory_space<vmem>>, vector<8x16xf32>,
    %37 = vector.extract_strided_slice %18 {offsets = [8, 0], sizes = [8, 16], strides = [1, 1]} : vector<32x16xf32> to vector<8x16xf32>
    %38 = vector.extract_strided_slice %19 {offsets = [8, 0], sizes = [8, 8], strides = [1, 1]} : vector<32x8xf32> to vector<8x8xf32>
    %39 = vector.extract_strided_slice %20 {offsets = [8, 0], sizes = [8, 8], strides = [1, 1]} : vector<32x8xf32> to vector<8x8xf32>
    %cst_25 = arith.constant dense<0.000000e+00> : vector<16x8xf32>
    %40 = tpu.matmul %37, %38, %cst_25 {dimension_numbers = #tpu.dot_dimension_numbers<[0], [0], [1], [1], [0, 1, 1, 1], [], []>} : vector<8x16xf32>, vector<8x8xf32>, vector<16x8xf32> -> vector<16x8xf32>
    %cst_26 = arith.constant dense<0xFF800000> : vector<16xf32>
    %41 = vector.multi_reduction <maximumf>, %40, %cst_26 [1] : vector<16x8xf32> to vector<16xf32>
    %42 = vector.shape_cast %41 : vector<16xf32> to vector<16x1xf32>
    %43 = vector.broadcast %42 : vector<16x1xf32> to vector<16x8xf32>
    %44 = arith.subf %40, %43 : vector<16x8xf32>
    %45 = math.exp %44 : vector<16x8xf32>
    %cst_27 = arith.constant dense<0.000000e+00> : vector<16xf32>
    %46 = vector.multi_reduction <add>, %45, %cst_27 [1] : vector<16x8xf32> to vector<16xf32>
    %47 = vector.shape_cast %46 : vector<16xf32> to vector<16x1xf32>
    %48 = tpu.reciprocal %47 : vector<16x1xf32> -> vector<16x1xf32>
    %49 = vector.broadcast %48 : vector<16x1xf32> to vector<16x8xf32>
    %50 = arith.mulf %45, %49 : vector<16x8xf32>
    %cst_28 = arith.constant dense<0.000000e+00> : vector<8x16xf32>
    %51 = tpu.matmul %39, %50, %cst_28 {dimension_numbers = #tpu.dot_dimension_numbers<[1], [1], [0], [0], [0, 0, 1, 0], [], []>} : vector<8x8xf32>, vector<16x8xf32>, vector<8x16xf32> -> vector<8x16xf32>
    %c8 = arith.constant 8 : index
    %c0_29 = arith.constant 0 : index
    %52 = vector.load %arg14[%c8, %c0_29] : memref<32x32xf32, #tpu.memory_space<vmem>>, vector<8x16xf32>
    tpu.vector_store %arg14[%c8, %c0_29], %51 {strides = array<i32>} : memref<32x32xf32, #tpu.memory_space<vmem>>, vector<8x16xf32>,
    %53 = vector.extract_strided_slice %18 {offsets = [16, 0], sizes = [8, 16], strides = [1, 1]} : vector<32x16xf32> to vector<8x16xf32>
    %54 = vector.extract_strided_slice %19 {offsets = [16, 0], sizes = [8, 8], strides = [1, 1]} : vector<32x8xf32> to vector<8x8xf32>
    %55 = vector.extract_strided_slice %20 {offsets = [16, 0], sizes = [8, 8], strides = [1, 1]} : vector<32x8xf32> to vector<8x8xf32>
    %cst_30 = arith.constant dense<0.000000e+00> : vector<16x8xf32>
    %56 = tpu.matmul %53, %54, %cst_30 {dimension_numbers = #tpu.dot_dimension_numbers<[0], [0], [1], [1], [0, 1, 1, 1], [], []>} : vector<8x16xf32>, vector<8x8xf32>, vector<16x8xf32> -> vector<16x8xf32>
    %cst_31 = arith.constant dense<0xFF800000> : vector<16xf32>
    %57 = vector.multi_reduction <maximumf>, %56, %cst_31 [1] : vector<16x8xf32> to vector<16xf32>
    %58 = vector.shape_cast %57 : vector<16xf32> to vector<16x1xf32>
    %59 = vector.broadcast %58 : vector<16x1xf32> to vector<16x8xf32>
    %60 = arith.subf %56, %59 : vector<16x8xf32>
    %61 = math.exp %60 : vector<16x8xf32>
    %cst_32 = arith.constant dense<0.000000e+00> : vector<16xf32>
    %62 = vector.multi_reduction <add>, %61, %cst_32 [1] : vector<16x8xf32> to vector<16xf32>
    %63 = vector.shape_cast %62 : vector<16xf32> to vector<16x1xf32>
    %64 = tpu.reciprocal %63 : vector<16x1xf32> -> vector<16x1xf32>
    %65 = vector.broadcast %64 : vector<16x1xf32> to vector<16x8xf32>
    %66 = arith.mulf %61, %65 : vector<16x8xf32>
    %cst_33 = arith.constant dense<0.000000e+00> : vector<8x16xf32>
    %67 = tpu.matmul %55, %66, %cst_33 {dimension_numbers = #tpu.dot_dimension_numbers<[1], [1], [0], [0], [0, 0, 1, 0], [], []>} : vector<8x8xf32>, vector<16x8xf32>, vector<8x16xf32> -> vector<8x16xf32>
    %c16 = arith.constant 16 : index
    %c0_34 = arith.constant 0 : index
    %68 = vector.load %arg14[%c16, %c0_34] : memref<32x32xf32, #tpu.memory_space<vmem>>, vector<8x16xf32>
    tpu.vector_store %arg14[%c16, %c0_34], %67 {strides = array<i32>} : memref<32x32xf32, #tpu.memory_space<vmem>>, vector<8x16xf32>,
    %69 = vector.extract_strided_slice %18 {offsets = [24, 0], sizes = [8, 16], strides = [1, 1]} : vector<32x16xf32> to vector<8x16xf32>
    %70 = vector.extract_strided_slice %19 {offsets = [24, 0], sizes = [8, 8], strides = [1, 1]} : vector<32x8xf32> to vector<8x8xf32>
    %71 = vector.extract_strided_slice %20 {offsets = [24, 0], sizes = [8, 8], strides = [1, 1]} : vector<32x8xf32> to vector<8x8xf32>
    %cst_35 = arith.constant dense<0.000000e+00> : vector<16x8xf32>
    %72 = tpu.matmul %69, %70, %cst_35 {dimension_numbers = #tpu.dot_dimension_numbers<[0], [0], [1], [1], [0, 1, 1, 1], [], []>} : vector<8x16xf32>, vector<8x8xf32>, vector<16x8xf32> -> vector<16x8xf32>
    %cst_36 = arith.constant dense<0xFF800000> : vector<16xf32>
    %73 = vector.multi_reduction <maximumf>, %72, %cst_36 [1] : vector<16x8xf32> to vector<16xf32>
    %74 = vector.shape_cast %73 : vector<16xf32> to vector<16x1xf32>
    %75 = vector.broadcast %74 : vector<16x1xf32> to vector<16x8xf32>
    %76 = arith.subf %72, %75 : vector<16x8xf32>
    %77 = math.exp %76 : vector<16x8xf32>
    %cst_37 = arith.constant dense<0.000000e+00> : vector<16xf32>
    %78 = vector.multi_reduction <add>, %77, %cst_37 [1] : vector<16x8xf32> to vector<16xf32>
    %79 = vector.shape_cast %78 : vector<16xf32> to vector<16x1xf32>
    %80 = tpu.reciprocal %79 : vector<16x1xf32> -> vector<16x1xf32>
    %81 = vector.broadcast %80 : vector<16x1xf32> to vector<16x8xf32>
    %82 = arith.mulf %77, %81 : vector<16x8xf32>
    %cst_38 = arith.constant dense<0.000000e+00> : vector<8x16xf32>
    %83 = tpu.matmul %71, %82, %cst_38 {dimension_numbers = #tpu.dot_dimension_numbers<[1], [1], [0], [0], [0, 0, 1, 0], [], []>} : vector<8x8xf32>, vector<16x8xf32>, vector<8x16xf32> -> vector<8x16xf32>
    %c24 = arith.constant 24 : index
    %c0_39 = arith.constant 0 : index
    %84 = vector.load %arg14[%c24, %c0_39] : memref<32x32xf32, #tpu.memory_space<vmem>>, vector<8x16xf32>
    tpu.vector_store %arg14[%c24, %c0_39], %83 {strides = array<i32>} : memref<32x32xf32, #tpu.memory_space<vmem>>, vector<8x16xf32>,
    %85 = vector.extract_strided_slice %5 {offsets = [0, 16], sizes = [32, 16], strides = [1, 1]} : vector<32x32xf32> to vector<32x16xf32>
    %86 = vector.extract_strided_slice %11 {offsets = [0, 8], sizes = [32, 8], strides = [1, 1]} : vector<32x16xf32> to vector<32x8xf32>
    %87 = vector.extract_strided_slice %17 {offsets = [0, 8], sizes = [32, 8], strides = [1, 1]} : vector<32x16xf32> to vector<32x8xf32>
    %88 = vector.extract_strided_slice %85 {offsets = [0, 0], sizes = [8, 16], strides = [1, 1]} : vector<32x16xf32> to vector<8x16xf32>
    %89 = vector.extract_strided_slice %86 {offsets = [0, 0], sizes = [8, 8], strides = [1, 1]} : vector<32x8xf32> to vector<8x8xf32>
    %90 = vector.extract_strided_slice %87 {offsets = [0, 0], sizes = [8, 8], strides = [1, 1]} : vector<32x8xf32> to vector<8x8xf32>
    %cst_40 = arith.constant dense<0.000000e+00> : vector<16x8xf32>
    %91 = tpu.matmul %88, %89, %cst_40 {dimension_numbers = #tpu.dot_dimension_numbers<[0], [0], [1], [1], [0, 1, 1, 1], [], []>} : vector<8x16xf32>, vector<8x8xf32>, vector<16x8xf32> -> vector<16x8xf32>
    %cst_41 = arith.constant dense<0xFF800000> : vector<16xf32>
    %92 = vector.multi_reduction <maximumf>, %91, %cst_41 [1] : vector<16x8xf32> to vector<16xf32>
    %93 = vector.shape_cast %92 : vector<16xf32> to vector<16x1xf32>
    %94 = vector.broadcast %93 : vector<16x1xf32> to vector<16x8xf32>
    %95 = arith.subf %91, %94 : vector<16x8xf32>
    %96 = math.exp %95 : vector<16x8xf32>
    %cst_42 = arith.constant dense<0.000000e+00> : vector<16xf32>
    %97 = vector.multi_reduction <add>, %96, %cst_42 [1] : vector<16x8xf32> to vector<16xf32>
    %98 = vector.shape_cast %97 : vector<16xf32> to vector<16x1xf32>
    %99 = tpu.reciprocal %98 : vector<16x1xf32> -> vector<16x1xf32>
    %100 = vector.broadcast %99 : vector<16x1xf32> to vector<16x8xf32>
    %101 = arith.mulf %96, %100 : vector<16x8xf32>
    %cst_43 = arith.constant dense<0.000000e+00> : vector<8x16xf32>
    %102 = tpu.matmul %90, %101, %cst_43 {dimension_numbers = #tpu.dot_dimension_numbers<[1], [1], [0], [0], [0, 0, 1, 0], [], []>} : vector<8x8xf32>, vector<16x8xf32>, vector<8x16xf32> -> vector<8x16xf32>
    %c0_44 = arith.constant 0 : index
    %c16_45 = arith.constant 16 : index
    %103 = vector.load %arg14[%c0_44, %c16_45] : memref<32x32xf32, #tpu.memory_space<vmem>>, vector<8x16xf32>
    tpu.vector_store %arg14[%c0_44, %c16_45], %102 {strides = array<i32>} : memref<32x32xf32, #tpu.memory_space<vmem>>, vector<8x16xf32>,
    %104 = vector.extract_strided_slice %85 {offsets = [8, 0], sizes = [8, 16], strides = [1, 1]} : vector<32x16xf32> to vector<8x16xf32>
    %105 = vector.extract_strided_slice %86 {offsets = [8, 0], sizes = [8, 8], strides = [1, 1]} : vector<32x8xf32> to vector<8x8xf32>
    %106 = vector.extract_strided_slice %87 {offsets = [8, 0], sizes = [8, 8], strides = [1, 1]} : vector<32x8xf32> to vector<8x8xf32>
    %cst_46 = arith.constant dense<0.000000e+00> : vector<16x8xf32>
    %107 = tpu.matmul %104, %105, %cst_46 {dimension_numbers = #tpu.dot_dimension_numbers<[0], [0], [1], [1], [0, 1, 1, 1], [], []>} : vector<8x16xf32>, vector<8x8xf32>, vector<16x8xf32> -> vector<16x8xf32>
    %cst_47 = arith.constant dense<0xFF800000> : vector<16xf32>
    %108 = vector.multi_reduction <maximumf>, %107, %cst_47 [1] : vector<16x8xf32> to vector<16xf32>
    %109 = vector.shape_cast %108 : vector<16xf32> to vector<16x1xf32>
    %110 = vector.broadcast %109 : vector<16x1xf32> to vector<16x8xf32>
    %111 = arith.subf %107, %110 : vector<16x8xf32>
    %112 = math.exp %111 : vector<16x8xf32>
    %cst_48 = arith.constant dense<0.000000e+00> : vector<16xf32>
    %113 = vector.multi_reduction <add>, %112, %cst_48 [1] : vector<16x8xf32> to vector<16xf32>
    %114 = vector.shape_cast %113 : vector<16xf32> to vector<16x1xf32>
    %115 = tpu.reciprocal %114 : vector<16x1xf32> -> vector<16x1xf32>
    %116 = vector.broadcast %115 : vector<16x1xf32> to vector<16x8xf32>
    %117 = arith.mulf %112, %116 : vector<16x8xf32>
    %cst_49 = arith.constant dense<0.000000e+00> : vector<8x16xf32>
    %118 = tpu.matmul %106, %117, %cst_49 {dimension_numbers = #tpu.dot_dimension_numbers<[1], [1], [0], [0], [0, 0, 1, 0], [], []>} : vector<8x8xf32>, vector<16x8xf32>, vector<8x16xf32> -> vector<8x16xf32>
    %c8_50 = arith.constant 8 : index
    %c16_51 = arith.constant 16 : index
    %119 = vector.load %arg14[%c8_50, %c16_51] : memref<32x32xf32, #tpu.memory_space<vmem>>, vector<8x16xf32>
    tpu.vector_store %arg14[%c8_50, %c16_51], %118 {strides = array<i32>} : memref<32x32xf32, #tpu.memory_space<vmem>>, vector<8x16xf32>,
    %120 = vector.extract_strided_slice %85 {offsets = [16, 0], sizes = [8, 16], strides = [1, 1]} : vector<32x16xf32> to vector<8x16xf32>
    %121 = vector.extract_strided_slice %86 {offsets = [16, 0], sizes = [8, 8], strides = [1, 1]} : vector<32x8xf32> to vector<8x8xf32>
    %122 = vector.extract_strided_slice %87 {offsets = [16, 0], sizes = [8, 8], strides = [1, 1]} : vector<32x8xf32> to vector<8x8xf32>
    %cst_52 = arith.constant dense<0.000000e+00> : vector<16x8xf32>
    %123 = tpu.matmul %120, %121, %cst_52 {dimension_numbers = #tpu.dot_dimension_numbers<[0], [0], [1], [1], [0, 1, 1, 1], [], []>} : vector<8x16xf32>, vector<8x8xf32>, vector<16x8xf32> -> vector<16x8xf32>
    %cst_53 = arith.constant dense<0xFF800000> : vector<16xf32>
    %124 = vector.multi_reduction <maximumf>, %123, %cst_53 [1] : vector<16x8xf32> to vector<16xf32>
    %125 = vector.shape_cast %124 : vector<16xf32> to vector<16x1xf32>
    %126 = vector.broadcast %125 : vector<16x1xf32> to vector<16x8xf32>
    %127 = arith.subf %123, %126 : vector<16x8xf32>
    %128 = math.exp %127 : vector<16x8xf32>
    %cst_54 = arith.constant dense<0.000000e+00> : vector<16xf32>
    %129 = vector.multi_reduction <add>, %128, %cst_54 [1] : vector<16x8xf32> to vector<16xf32>
    %130 = vector.shape_cast %129 : vector<16xf32> to vector<16x1xf32>
    %131 = tpu.reciprocal %130 : vector<16x1xf32> -> vector<16x1xf32>
    %132 = vector.broadcast %131 : vector<16x1xf32> to vector<16x8xf32>
    %133 = arith.mulf %128, %132 : vector<16x8xf32>
    %cst_55 = arith.constant dense<0.000000e+00> : vector<8x16xf32>
    %134 = tpu.matmul %122, %133, %cst_55 {dimension_numbers = #tpu.dot_dimension_numbers<[1], [1], [0], [0], [0, 0, 1, 0], [], []>} : vector<8x8xf32>, vector<16x8xf32>, vector<8x16xf32> -> vector<8x16xf32>
    %c16_56 = arith.constant 16 : index
    %c16_57 = arith.constant 16 : index
    %135 = vector.load %arg14[%c16_56, %c16_57] : memref<32x32xf32, #tpu.memory_space<vmem>>, vector<8x16xf32>
    tpu.vector_store %arg14[%c16_56, %c16_57], %134 {strides = array<i32>} : memref<32x32xf32, #tpu.memory_space<vmem>>, vector<8x16xf32>,
    %136 = vector.extract_strided_slice %85 {offsets = [24, 0], sizes = [8, 16], strides = [1, 1]} : vector<32x16xf32> to vector<8x16xf32>
    %137 = vector.extract_strided_slice %86 {offsets = [24, 0], sizes = [8, 8], strides = [1, 1]} : vector<32x8xf32> to vector<8x8xf32>
    %138 = vector.extract_strided_slice %87 {offsets = [24, 0], sizes = [8, 8], strides = [1, 1]} : vector<32x8xf32> to vector<8x8xf32>
    %cst_58 = arith.constant dense<0.000000e+00> : vector<16x8xf32>
    %139 = tpu.matmul %136, %137, %cst_58 {dimension_numbers = #tpu.dot_dimension_numbers<[0], [0], [1], [1], [0, 1, 1, 1], [], []>} : vector<8x16xf32>, vector<8x8xf32>, vector<16x8xf32> -> vector<16x8xf32>
    %cst_59 = arith.constant dense<0xFF800000> : vector<16xf32>
    %140 = vector.multi_reduction <maximumf>, %139, %cst_59 [1] : vector<16x8xf32> to vector<16xf32>
    %141 = vector.shape_cast %140 : vector<16xf32> to vector<16x1xf32>
    %142 = vector.broadcast %141 : vector<16x1xf32> to vector<16x8xf32>
    %143 = arith.subf %139, %142 : vector<16x8xf32>
    %144 = math.exp %143 : vector<16x8xf32>
    %cst_60 = arith.constant dense<0.000000e+00> : vector<16xf32>
    %145 = vector.multi_reduction <add>, %144, %cst_60 [1] : vector<16x8xf32> to vector<16xf32>
    %146 = vector.shape_cast %145 : vector<16xf32> to vector<16x1xf32>
    %147 = tpu.reciprocal %146 : vector<16x1xf32> -> vector<16x1xf32>
    %148 = vector.broadcast %147 : vector<16x1xf32> to vector<16x8xf32>
    %149 = arith.mulf %144, %148 : vector<16x8xf32>
    %cst_61 = arith.constant dense<0.000000e+00> : vector<8x16xf32>
    %150 = tpu.matmul %138, %149, %cst_61 {dimension_numbers = #tpu.dot_dimension_numbers<[1], [1], [0], [0], [0, 0, 1, 0], [], []>} : vector<8x8xf32>, vector<16x8xf32>, vector<8x16xf32> -> vector<8x16xf32>
    %c24_62 = arith.constant 24 : index
    %c16_63 = arith.constant 16 : index
    %151 = vector.load %arg14[%c24_62, %c16_63] : memref<32x32xf32, #tpu.memory_space<vmem>>, vector<8x16xf32>
    tpu.vector_store %arg14[%c24_62, %c16_63], %150 {strides = array<i32>} : memref<32x32xf32, #tpu.memory_space<vmem>>, vector<8x16xf32>,
    %c0_64 = arith.constant 0 : index
    %c0_65 = arith.constant 0 : index
    %152 = vector.load %arg9[%c0_64, %c0_65] : memref<32x32xf32, #tpu.memory_space<vmem>>, vector<32x32xf32>
    %c0_66 = arith.constant 0 : index
    %c0_67 = arith.constant 0 : index
    %153 = vector.load %arg14[%c0_66, %c0_67] : memref<32x32xf32, #tpu.memory_space<vmem>>, vector<32x32xf32>
    %cst_68 = arith.constant dense<0.000000e+00> : vector<32x32xf32>
    %154 = tpu.matmul %152, %153, %cst_68 {dimension_numbers = #tpu.dot_dimension_numbers<[1], [0], [0], [1], [0, 0, 1, 1], [], []>} : vector<32x32xf32>, vector<32x32xf32>, vector<32x32xf32> -> vector<32x32xf32>
    %c0_69 = arith.constant 0 : index
    %c0_70 = arith.constant 0 : index
    %155 = vector.load %arg10[%c0_69, %c0_70] : memref<32x1xf32, #tpu.memory_space<vmem>>, vector<32x1xf32>
    %156 = vector.broadcast %155 : vector<32x1xf32> to vector<32x32xf32>
    %157 = arith.addf %154, %156 : vector<32x32xf32>
    %158 = arith.addf %0, %157 : vector<32x32xf32>
    %cst_71 = arith.constant dense<0.000000e+00> : vector<32xf32>
    %159 = vector.multi_reduction <add>, %158, %cst_71 [1] : vector<32x32xf32> to vector<32xf32>
    %160 = vector.shape_cast %159 : vector<32xf32> to vector<32x1xf32>
    %161 = arith.mulf %158, %158 : vector<32x32xf32>
    %cst_72 = arith.constant dense<0.000000e+00> : vector<32xf32>
    %162 = vector.multi_reduction <add>, %161, %cst_72 [1] : vector<32x32xf32> to vector<32xf32>
    %163 = vector.shape_cast %162 : vector<32xf32> to vector<32x1xf32>
    %cst_73 = arith.constant 3.125000e-02 : f32
    %164 = vector.broadcast %cst_73 : f32 to vector<32x1xf32>
    %165 = arith.mulf %160, %164 : vector<32x1xf32>
    %cst_74 = arith.constant 3.125000e-02 : f32
    %166 = vector.broadcast %cst_74 : f32 to vector<32x1xf32>
    %167 = arith.mulf %163, %166 : vector<32x1xf32>
    %168 = arith.mulf %165, %165 : vector<32x1xf32>
    %169 = arith.subf %167, %168 : vector<32x1xf32>
    %cst_75 = arith.constant 0.000000e+00 : f32
    %170 = vector.broadcast %cst_75 : f32 to vector<32x1xf32>
    %171 = arith.maximumf %169, %170 : vector<32x1xf32>
    %cst_76 = arith.constant 9.99999974E-6 : f32
    %172 = vector.broadcast %cst_76 : f32 to vector<32x1xf32>
    %173 = arith.addf %171, %172 : vector<32x1xf32>
    %174 = math.rsqrt %173 : vector<32x1xf32>
    %c0_77 = arith.constant 0 : index
    %c0_78 = arith.constant 0 : index
    %175 = vector.load %arg11[%c0_77, %c0_78] : memref<32x1xf32, #tpu.memory_space<vmem>>, vector<32x1xf32>
    %176 = arith.mulf %174, %175 : vector<32x1xf32>
    %c0_79 = arith.constant 0 : index
    %c0_80 = arith.constant 0 : index
    %177 = vector.load %arg12[%c0_79, %c0_80] : memref<32x1xf32, #tpu.memory_space<vmem>>, vector<32x1xf32>
    %178 = arith.mulf %165, %176 : vector<32x1xf32>
    %179 = arith.subf %177, %178 : vector<32x1xf32>
    %180 = vector.broadcast %176 : vector<32x1xf32> to vector<32x32xf32>
    %181 = arith.mulf %158, %180 : vector<32x32xf32>
    %182 = vector.broadcast %179 : vector<32x1xf32> to vector<32x32xf32>
    %183 = arith.addf %181, %182 : vector<32x32xf32>
    %c0_81 = arith.constant 0 : index
    %c0_82 = arith.constant 0 : index
    %184 = vector.load %arg13[%c0_81, %c0_82] : memref<32x32xf32, #tpu.memory_space<vmem>>, vector<32x32xf32>
    tpu.vector_store %arg13[%c0_81, %c0_82], %183 {strides = array<i32>} : memref<32x32xf32, #tpu.memory_space<vmem>>, vector<32x32xf32>,
    return
  }
}

</mosaic_0001>

<bundles_post_ra>
// kernel: tpu_custom_call.1
= control target key start
LH: loop header
LB: loop body
LE: loop exit
PB: predicated region body
PF: predicated region fallthrough
CT: control target
= control target key end

     0   :  { %vm77_vm0 = vcmask 261120   ;;  %v2949_v6 = vmov 0   ;;  %s3462_s0 = inlined_call_operand.vmem [shape: f32[32,32], index: 0, kind: input, shape index: {}]   ;;  %s3463_s1 = inlined_call_operand.vmem [shape: f32[32,16], index: 1, kind: input, shape index: {}]   ;;  %s3464_s2 = inlined_call_operand.vmem [shape: f32[32,16], index: 2, kind: input, shape index: {}]   ;;  %s3465_s3 = inlined_call_operand.vmem [shape: f32[32,32], index: 3, kind: input, shape index: {}]   ;;  %s3466_s4 = inlined_call_operand.vmem [shape: f32[32,32], index: 4, kind: input, shape index: {}]   ;;  %s3467_s5 = inlined_call_operand.vmem [shape: f32[32,32], index: 5, kind: input, shape index: {}]   ;;  %s3468_s6 = inlined_call_operand.vmem [shape: f32[32,1], index: 6, kind: input, shape index: {}]   ;;  %s3469_s7 = inlined_call_operand.vmem [shape: f32[32,1], index: 7, kind: input, shape index: {}]   ;;  %s3470_s8 = inlined_call_operand.vmem [shape: f32[32,1], index: 8, kind: input, shape index: {}]   ;;  %s3471_s9 = inlined_call_operand.vmem [shape: f32[32,32], index: 9, kind: input, shape index: {}]   ;;  %s3472_s10 = inlined_call_operand.vmem [shape: f32[32,1], index: 10, kind: input, shape index: {}]   ;;  %s3473_s11 = inlined_call_operand.vmem [shape: f32[32,1], index: 11, kind: input, shape index: {}]   ;;  %s3474_s12 = inlined_call_operand.vmem [shape: f32[32,1], index: 12, kind: input, shape index: {}]   ;;  %s3475_s13 = inlined_call_operand.hbm [shape: f32[32,32], index: 13, kind: output, shape index: {}]  }
   0x1   :  { %v45_v0 = vld [vmem:[%s3462_s0] sm:$0xff]  ;;  %v46_v1 = vld [vmem:[%s3462_s0 + $0x8] sm:$0xff]  ;;  %v47_v2 = vld [vmem:[%s3462_s0 + $0x10] sm:$0xff]  ;;  %2847 = vset.pattern.permute.xlu0 %v2949_v6  ;;  %2848 = vset.pattern.permute.xlu1 %v2949_v6 }
   0x2   :  { %v2773_v3 = vpack.c.bf16 %v46_v1, %v45_v0  ;;  %v48_v4 = vld [vmem:[%s3462_s0 + $0x18] sm:$0xff]  ;;  %v49_v5 = vld [vmem:[%s3465_s3] sm:$0xff]  ;;  %v180_v9 = vld [vmem:[%s3463_s1 + $0x8] sm:$0xff] }
   0x3   :  { %v2777_v7 = vpack.c.bf16 %v48_v4, %v47_v2  ;;  %2629 = vmatprep.mubr.msk.f32.mxu0 %vm77_vm0, %v49_v5  ;;  %v179_v8 = vld [vmem:[%s3463_s1] sm:$0xff]  ;;  %v181_v12 = vld [vmem:[%s3463_s1 + $0x10] sm:$0xff]  ;;  %v182_v13 = vld [vmem:[%s3463_s1 + $0x18] sm:$0xff] }
   0x4   :  { %v53_v10 = vld [vmem:[%s3468_s6] sm:$0xff]  ;;  %2774 = vmatprep.subr.bf16.mxu0 %v2773_v3  ;;  %v2781_v11 = vpack.c.bf16 %v180_v9, %v179_v8  ;;  %v2785_v14 = vpack.c.bf16 %v182_v13, %v181_v12  ;;  %v54_v15 = vld [vmem:[%s3468_s6 + $0x8] sm:$0xff] }
   0x5   :  { %59 = vperm.xlu0 %2847, %v53_v10   ;;  %2776 = vmatpush3.bf16.msra.mxu0 %v2773_v3  ;;  %v175_v16 = vld [vmem:[%s3466_s4] sm:$0xff] }
   0x6   :  { %2778 = vmatprep.subr.bf16.mxu0 %v2777_v7  ;;  %2782 = vmatprep.subr.bf16.mxu1 %v2781_v11  ;;  %v183_v17 = vld [vmem:[%s3469_s7] sm:$0xff] }
   0x7   :  { %18 = vsyncpa [#allocation4], 0  ;;  %2784 = vmatpush3.bf16.msra.mxu1 %v2781_v11  ;;  %2643 = vmatprep.mubr.msk.f32.mxu1 %vm77_vm0, %v175_v16  ;;  %v50_v18 = vld [vmem:[%s3465_s3 + $0x8] sm:$0xff]  ;;  %v177_v21 = vld [vmem:[%s3466_s4 + $0x10] sm:$0xff]  ;;  %vm465_vm1 = vcmask 64512   ;;  %v2950_v11 = vmov 0.0|0.0  }
   0x8   :  { %2786 = vmatprep.subr.bf16.mxu1 %v2785_v14  ;;  %189 = vperm.xlu1 %2848, %v183_v17   ;;  %v184_v19 = vld [vmem:[%s3469_s7 + $0x8] sm:$0xff]  ;;  %v178_v22 = vld [vmem:[%s3466_s4 + $0x18] sm:$0xff]  ;;  %v51_v35 = vld [vmem:[%s3465_s3 + $0x10] sm:$0xff]  ;;  %vm2951_vm2 = vmmov 0   ;;  %v2952_v12 = vmov 0.0   ;;  %vm648_vm4 = vcmask 130048  }
   0x9   :  { %64 = vperm.xlu0 %2847, %v54_v15   ;;  %2780 = vmatpush3.bf16.msra.mxu0 %v2777_v7  ;;  %v176_v20 = vld [vmem:[%s3466_s4 + $0x8] sm:$0xff]  ;;  %v52_v36 = vld [vmem:[%s3465_s3 + $0x18] sm:$0xff]  ;;  %v308_v43 = vld [vmem:[%s3464_s2] sm:$0xff]  ;;  %s2955_s19 = smov 16   ;;  %vm1522_vm5 = vcmask 261248  }
   0xa   :  { %v309_v44 = vld [vmem:[%s3464_s2 + $0x8] sm:$0xff]  ;;  %v310_v45 = vld [vmem:[%s3464_s2 + $0x10] sm:$0xff]  ;;  %v311_v47 = vld [vmem:[%s3464_s2 + $0x18] sm:$0xff] }
   0xb   :  { %2788 = vmatpush3.bf16.msra.mxu1 %v2785_v14  ;;  %v2789_v46 = vpack.c.bf16 %v309_v44, %v308_v43  ;;  %v304_v48 = vld [vmem:[%s3467_s5] sm:$0xff]  ;;  %v2793_v49 = vpack.c.bf16 %v311_v47, %v310_v45  ;;  %v305_v50 = vld [vmem:[%s3467_s5 + $0x8] sm:$0xff]  ;;  %v56_v57 = vld [vmem:[%s3468_s6 + $0x18] sm:$0xff] }
   0xc   :  { %2630 = vmatmul.mubr.msk.f32.vlgmr.msra.gmra.mrb[0].mxu0 %vm77_vm0, %v50_v18  ;;  %194 = vperm.xlu1 %2848, %v184_v19   ;;  %v55_v60 = vld [vmem:[%s3468_s6 + $0x10] sm:$0xff]  ;;  %v313_v8 = vld [vmem:[%s3470_s8 + $0x8] sm:$0xff]  ;;  %v186_v10 = vld [vmem:[%s3469_s7 + $0x18] sm:$0xff] }
   0xd   :  { %2632 = vmatprep.mubr.msk.f32.mxu0 %vm77_vm0, %v51_v35  ;;  %2790 = vmatprep.subr.bf16.mxu0 %v2789_v46  ;;  %v185_v7 = vld [vmem:[%s3469_s7 + $0x10] sm:$0xff]  ;;  %vm3190_vm3 = vmpackc.low %vm465_vm1, %vm465_vm1 }
   0xe   :  { %2644 = vmatmul.mubr.msk.f32.vlgmr.msra.gmra.mrb[0].mxu1 %vm77_vm0, %v176_v20  ;;  %2792 = vmatpush3.bf16.msra.mxu0 %v2789_v46  ;;  %v306_v20 = vld [vmem:[%s3467_s5 + $0x10] sm:$0xff] }
   0xf   :  { %2646 = vmatprep.mubr.msk.f32.mxu1 %vm77_vm0, %v177_v21  ;;  %2794 = vmatprep.subr.bf16.mxu0 %v2793_v49  ;;  %v307_v21 = vld [vmem:[%s3467_s5 + $0x18] sm:$0xff]  ;;  %s2953_s5 = smov 112  }
  0x10   :  { %2633 = vmatmul.mubr.msk.f32.gmra.mrb[2].mxu0 %vm77_vm0, %v52_v36 }
  0x11   :  { %2657 = vmatprep.mubr.msk.f32.mxu0 %vm77_vm0, %v304_v48 }
  0x12   :  { %2647 = vmatmul.mubr.msk.f32.gmra.mrb[2].mxu1 %vm77_vm0, %v178_v22  ;;  %2796 = vmatpush3.bf16.msra.mxu0 %v2793_v49 }
  0x13   :  { %2797 = vmatprep.subr.bf16.mxu0 %v2950_v11 }
  0x15   :  { %2658 = vmatmul.mubr.msk.f32.vlgmr.msra.gmra.mrb[4].mxu0 %vm77_vm0, %v305_v50 }
  0x16   :  { %2660 = vmatprep.mubr.msk.f32.mxu0 %vm77_vm0, %v306_v20 }
  0x19   :  { %2661 = vmatmul.mubr.msk.f32.gmra.mrb[6].mxu0 %vm77_vm0, %v307_v21 }
  0x1a   :  { %2672 = vmatprep.mubr.msk.f32.mxu0 %vm2951_vm2, %v2952_v12 }
  0x84   :  { %v60_v23 = vpop.permute.xlu0 %59 }
  0x87   :  { %v190_v24 = vpop.permute.xlu1 %189 }
  0x88   :  { %v65_v25 = vpop.permute.xlu0 %64 }
  0x8b   :  { %v195_v29 = vpop.permute.xlu1 %194 }
  0xdf   :  { %v2631_v26 = vpop.f32.mrb[0].mxu0 }
  0xe0   :  { %v3089_v27 = vadd.f32 %v2631_v26, %v65_v25  ;;  %v156_v28 = vpop.f32.mrb[1].mxu0 }
  0xe1   :  { %v3091_v30 = vadd.f32 %v156_v28, %v60_v23  ;;  %v2645_v31 = vpop.f32.mrb[0].mxu1 }
  0xe2   :  { %650 = vxpose.xlu1.b32.start.end [1/1] (short) (narrow) %v3089_v27, 16  ;;  %v285_v32 = vpop.f32.mrb[1].mxu1  ;;  %v3097_v34 = vadd.f32 %v2645_v31, %v195_v29  ;;  %v2218_v31 = vld [vmem:[%s3472_s10 + $0x10] sm:$0xff] }
  0xe3   :  { %433 = vxpose.xlu0.b32.start.end [1/1] (short) (narrow) %v3091_v30, 16  ;;  %v3095_v33 = vadd.f32 %v285_v32, %v190_v24  ;;  %v2634_v58 = vpop.f32.mrb[2].mxu0 }
  0xe4   :  { %v166_v59 = vpop.f32.mrb[3].mxu0 }
  0xe5   :  { %2663 = vmatprep.subr.mxu1 %v3095_v33  ;;  %v3110_v37 = vpop.f32.mrb[2].mxu1 }
  0xe6   :  { %2664 = vmatpush3.msra.mxu1 %v3095_v33  ;;  %v3112_v38 = vpop.f32.mrb[3].mxu1 }
  0xe7   :  { %2675 = vmatprep.subr.mxu1 %v3097_v34 }
  0xe8   :  { %v2659_v9 = vpop.f32.mrb[4].mxu0 }
  0xe9   :  { %v3166_v13 = vpop.f32.mrb[5].mxu0 }
 0x162   :  { %v666_v40 = vpop.trf.xlu1 }
 0x163   :  { %v449_v39 = vpop.trf.xlu0 }
 0x164   :  { %2665 = vmatprep.mubr.msk.f32.mxu1 %vm465_vm1, %v449_v39 }
 0x166   :  { %v667_v42 = vpop.trf.xlu1 }
 0x167   :  { %v450_v41 = vpop.trf.xlu0 }
 0x168   :  { %2666 = vmatmul.mubr.msk.f32.vlgmr.msra.gmra.mrb[4].mxu1 %vm465_vm1, %v450_v41 }
 0x169   :  { %2676 = vmatpush3.msra.mxu1 %v3097_v34  ;;  %2677 = vmatprep.mubr.msk.f32.mxu1 %vm465_vm1, %v666_v40 }
 0x16a   :  { %2801 = vmatprep.subr.bf16.mxu1 %v2950_v11 }
 0x16c   :  { %2678 = vmatmul.mubr.msk.f32.vlgmr.msra.gmra.mrb[6].mxu1 %vm465_vm1, %v667_v42 }
 0x16d   :  { %2684 = vmatprep.mubr.msk.f32.mxu1 %vm2951_vm2, %v2952_v12 }
 0x23b   :  { %v3139_v51 = vpop.f32.mrb[4].mxu1 }
 0x23c   :  { %v3141_v52 = vpop.f32.mrb[5].mxu1  ;;  %v550_v18 = vsel %vm465_vm1, %v3139_v51, -inf }
 0x23d   :  { %v547_v19 = vsel %vm465_vm1, %v3141_v52, -inf }
 0x23f   :  { %v2679_v53 = vpop.f32.mrb[6].mxu1 }
 0x240   :  { %v754_v54 = vpop.f32.mrb[7].mxu1  ;;  %v766_v55 = vsel %vm465_vm1, %v2679_v53, -inf }
 0x241   :  { %767 = vmax.xlane.f32.xlu1 %v766_v55  ;;  %v763_v56 = vsel %vm465_vm1, %v754_v54, -inf }
 0x242   :  { %764 = vmax.xlane.f32.xlu0 %v763_v56 }
 0x252   :  { %74 = vperm.xlu1 %2848, %v56_v57  }
 0x258   :  { %69 = vperm.xlu0 %2847, %v55_v60  }
 0x2ce   :  { %v768_v61 = vpop.xlane.xlu1 %767 }
 0x2cf   :  { %v770_v62 = vsub.f32 %v2679_v53, %v768_v61  ;;  %v765_v63 = vpop.xlane.xlu0 %764 }
 0x2d0   :  { %v769_v0 = vsub.f32 %v754_v54, %v765_v63 }
 0x2d1   :  { %v773_v1 = vmul.f32 1.442695, %v770_v62 }
 0x2d2   :  { %v771_v2 = vmul.f32 1.442695, %v769_v0  ;;  %v75_v14 = vpop.permute.xlu1 %74  ;;  %v312_v0 = vld [vmem:[%s3470_s8] sm:$0xff] }
 0x2d3   :  { %2849 = vpow2.f32 %v773_v1  ;;  %v3168_v16 = vadd.f32 %v2634_v58, %v75_v14  ;;  %v315_v1 = vld [vmem:[%s3470_s8 + $0x18] sm:$0xff] }
 0x2d4   :  { %2851 = vpow2.f32 %v771_v2  ;;  %v314_v2 = vld [vmem:[%s3470_s8 + $0x10] sm:$0xff]  ;;  %s2954_s8 = smov 120  }
 0x2d7   :  { %v70_v15 = vpop.permute.xlu0 %69 }
 0x2d8   :  { %v3170_v17 = vadd.f32 %v166_v59, %v70_v15 }
 0x2dd   :  { %v2850_v3 = vpop.eup %2849 }
 0x2de   :  { %v2852_v4 = vpop.eup %2851  ;;  %v778_v5 = vsel %vm465_vm1, %v2850_v3, 0.0 }
 0x2df   :  { %779 = vadd.xlane.f32.xlu1 %v778_v5  ;;  %v775_v6 = vsel %vm465_vm1, %v2852_v4, 0.0 }
 0x2e0   :  { %776 = vadd.xlane.f32.xlu0 %v775_v6 }
 0x2f0   :  { %199 = vperm.xlu1 %2848, %v185_v7  }
 0x2f6   :  { %323 = vperm.xlu0 %2847, %v313_v8  }
 0x2fa   :  { %204 = vperm.xlu0 %2847, %v186_v10  }
 0x318   :  { %1080 = vxpose.xlu0.b32.start.end [1/1] (short) (narrow) %v3168_v16, 16 }
 0x319   :  { %865 = vxpose.xlu1.b32.start.end [1/1] (short) (narrow) %v3170_v17, 16 }
 0x344   :  { %551 = vmax.xlane.f32.xlu1 %v550_v18 }
 0x349   :  { %548 = vmax.xlane.f32.xlu0 %v547_v19 }
 0x36c   :  { %v780_v22 = vpop.xlane.xlu1 %779 }
 0x36d   :  { %2853 = vrcp.f32 %v780_v22  ;;  %v777_v23 = vpop.xlane.xlu0 %776 }
 0x36e   :  { %2855 = vrcp.f32 %v777_v23 }
 0x370   :  { %v200_v29 = vpop.permute.xlu1 %199 }
 0x371   :  { %v3195_v36 = vadd.f32 %v3112_v38, %v200_v29 }
 0x375   :  { %v324_v32 = vpop.permute.xlu0 %323 }
 0x376   :  { %v3200_v40 = vadd.f32 %v2659_v9, %v324_v32 }
 0x377   :  { %v2854_v24 = vpop.eup %2853 }
 0x378   :  { %v2856_v25 = vpop.eup %2855  ;;  %v784_v26 = vmul.f32 %v2854_v24, %v2850_v3  ;;  %v3239_v3 = vpop.f32.mrb[6].mxu0 }
 0x379   :  { %v783_v28 = vmul.f32 %v2856_v25, %v2852_v4  ;;  %v205_v39 = vpop.permute.xlu0 %204 }
 0x37a   :  { %v3203_v41 = vadd.f32 %v3110_v37, %v205_v39 }
 0x37b   :  { %v2802_v35 = vpack.c.bf16 %v784_v26, %v783_v28 }
 0x37d   :  { %2804 = vmatpush3.bf16.xpose.msk.msra.mxu1 %vm3190_vm3, %v2802_v35 }
 0x37e   :  { %2687 = vmatprep.subr.mxu1 %v3195_v36 }
 0x384   :  { %2685 = vmatmul.mubr.msk.f32.vlgmr.msra.gmra.mrb[8].mxu1 %vm465_vm1, %v3200_v40 }
 0x385   :  { %2688 = vmatpush3.msra.mxu1 %v3195_v36 }
 0x386   :  { %2699 = vmatprep.subr.mxu1 %v3203_v41 }
 0x398   :  { %v1096_v42 = vpop.trf.xlu0 }
 0x399   :  { %v881_v38 = vpop.trf.xlu1 }
 0x39a   :  { %2689 = vmatprep.mubr.msk.f32.mxu1 %vm465_vm1, %v881_v38 }
 0x39c   :  { %v1097_v37 = vpop.trf.xlu0 }
 0x39d   :  { %v882_v43 = vpop.trf.xlu1 }
 0x39e   :  { %2690 = vmatmul.mubr.msk.f32.vlgmr.msra.gmra.mrb[10].mxu1 %vm465_vm1, %v882_v43 }
 0x39f   :  { %2700 = vmatpush3.msra.mxu1 %v3203_v41  ;;  %2701 = vmatprep.mubr.msk.f32.mxu1 %vm465_vm1, %v1096_v42 }
 0x3a0   :  { %2809 = vmatprep.subr.bf16.mxu1 %v2950_v11 }
 0x3a2   :  { %2702 = vmatmul.mubr.msk.f32.vlgmr.msra.gmra.mrb[12].mxu1 %vm465_vm1, %v1097_v37 }
 0x3a3   :  { %2708 = vmatprep.mubr.msk.f32.mxu1 %vm2951_vm2, %v2952_v12 }
 0x3d1   :  { %v552_v46 = vpop.xlane.xlu1 %551 }
 0x3d2   :  { %v554_v48 = vsub.f32 %v3139_v51, %v552_v46 }
 0x3d4   :  { %v557_v50 = vmul.f32 1.442695, %v554_v48 }
 0x3d6   :  { %v549_v47 = vpop.xlane.xlu0 %548  ;;  %2857 = vpow2.f32 %v557_v50 }
 0x3d7   :  { %v553_v49 = vsub.f32 %v3141_v52, %v549_v47 }
 0x3d9   :  { %v555_v53 = vmul.f32 1.442695, %v553_v49 }
 0x3db   :  { %2859 = vpow2.f32 %v555_v53 }
 0x3e0   :  { %v2858_v61 = vpop.eup %2857 }
 0x3e1   :  { %v562_v62 = vsel %vm465_vm1, %v2858_v61, 0.0 }
 0x3e5   :  { %v2860_v52 = vpop.eup %2859 }
 0x3e6   :  { %v559_v63 = vsel %vm465_vm1, %v2860_v52, 0.0 }
 0x457   :  { %v860_v44 = vpop.f32.mrb[8].mxu1 }
 0x458   :  { %864 = vst.msk [vmem:[#allocation2 + $0x8] sm:$0xff] %vm648_vm4, %v860_v44  ;;  %v2686_v45 = vpop.f32.mrb[9].mxu1 }
 0x471   :  { %v2691_v54 = vpop.f32.mrb[10].mxu1 }
 0x472   :  { %v969_v55 = vpop.f32.mrb[11].mxu1  ;;  %v981_v56 = vsel %vm465_vm1, %v2691_v54, -inf }
 0x473   :  { %982 = vmax.xlane.f32.xlu1 %v981_v56  ;;  %v978_v57 = vsel %vm465_vm1, %v969_v55, -inf }
 0x474   :  { %979 = vmax.xlane.f32.xlu0 %v978_v57 }
 0x475   :  { %v2703_v58 = vpop.f32.mrb[12].mxu1 }
 0x476   :  { %v1184_v59 = vpop.f32.mrb[13].mxu1  ;;  %v1196_v60 = vsel %vm465_vm1, %v2703_v58, -inf }
 0x477   :  { %1197 = vmax.xlane.f32.xlu1 %v1196_v60  ;;  %v1193_v51 = vsel %vm465_vm1, %v1184_v59, -inf }
 0x478   :  { %1194 = vmax.xlane.f32.xlu0 %v1193_v51 }
 0x47b   :  { %563 = vadd.xlane.f32.xlu1 %v562_v62 }
 0x47c   :  { %560 = vadd.xlane.f32.xlu0 %v559_v63 }
 0x48c   :  { %1525 = vrot.lane.b32.xlu1 %v3089_v27, %s2953_s5  ;;  %v3241_v27 = vpop.f32.mrb[7].mxu0 }
 0x490   :  { %318 = vperm.xlu1 %2848, %v312_v0  }
 0x492   :  { %1296 = vrot.lane.b32.xlu0 %v3091_v30, %s2953_s5 }
 0x494   :  { %333 = vperm.xlu1 %2848, %v315_v1  }
 0x496   :  { %328 = vperm.xlu0 %2847, %v314_v2  }
 0x500   :  { %v983_v4 = vpop.xlane.xlu1 %982 }
 0x501   :  { %v985_v5 = vsub.f32 %v2691_v54, %v983_v4  ;;  %v980_v6 = vpop.xlane.xlu0 %979 }
 0x502   :  { %v984_v7 = vsub.f32 %v969_v55, %v980_v6 }
 0x503   :  { %v988_v8 = vmul.f32 1.442695, %v985_v5 }
 0x504   :  { %v986_v9 = vmul.f32 1.442695, %v984_v7  ;;  %v1198_v10 = vpop.xlane.xlu1 %1197 }
 0x505   :  { %2861 = vpow2.f32 %v988_v8  ;;  %v1200_v14 = vsub.f32 %v2703_v58, %v1198_v10  ;;  %v1195_v30 = vpop.xlane.xlu0 %1194 }
 0x506   :  { %2863 = vpow2.f32 %v986_v9  ;;  %v1199_v15 = vsub.f32 %v1184_v59, %v1195_v30 }
 0x507   :  { %v1203_v18 = vmul.f32 1.442695, %v1200_v14 }
 0x508   :  { %v1201_v19 = vmul.f32 1.442695, %v1199_v15  ;;  %v564_v20 = vpop.xlane.xlu1 %563 }
 0x509   :  { %2865 = vpow2.f32 %v1203_v18  ;;  %v561_v21 = vpop.xlane.xlu0 %560 }
 0x50a   :  { %2867 = vpow2.f32 %v1201_v19 }
 0x50b   :  { %2869 = vrcp.f32 %v564_v20 }
 0x50c   :  { %2871 = vrcp.f32 %v561_v21  ;;  %v1526_v43 = vpop.permute.xlu1 %1525 }
 0x50d   :  { %v1297_v46 = vpop.permute.xlu0 %1296 }
 0x50f   :  { %v2862_v22 = vpop.eup %2861 }
 0x510   :  { %v2864_v23 = vpop.eup %2863  ;;  %v993_v24 = vsel %vm465_vm1, %v2862_v22, 0.0  ;;  %v319_v44 = vpop.permute.xlu1 %318 }
 0x511   :  { %994 = vadd.xlane.f32.xlu1 %v993_v24  ;;  %v990_v25 = vsel %vm465_vm1, %v2864_v23, 0.0  ;;  %v3251_v45 = vadd.f32 %v3166_v13, %v319_v44 }
 0x512   :  { %991 = vadd.xlane.f32.xlu0 %v990_v25 }
 0x513   :  { %v2866_v26 = vpop.eup %2865 }
 0x514   :  { %v2868_v28 = vpop.eup %2867  ;;  %v1208_v29 = vsel %vm465_vm1, %v2866_v26, 0.0  ;;  %v334_v47 = vpop.permute.xlu1 %333 }
 0x515   :  { %v2870_v32 = vpop.eup %2869  ;;  %1209 = vadd.xlane.f32.xlu1 %v1208_v29  ;;  %v1205_v35 = vsel %vm465_vm1, %v2868_v28, 0.0  ;;  %v329_v48 = vpop.permute.xlu0 %328  ;;  %v3271_v63 = vadd.f32 %v3239_v3, %v334_v47 }
 0x516   :  { %v2872_v39 = vpop.eup %2871  ;;  %v568_v38 = vmul.f32 %v2870_v32, %v2858_v61  ;;  %1206 = vadd.xlane.f32.xlu0 %v1205_v35  ;;  %v3266_v62 = vadd.f32 %v3241_v27, %v329_v48 }
 0x517   :  { %v567_v42 = vmul.f32 %v2872_v39, %v2860_v52 }
 0x519   :  { %v2798_v37 = vpack.c.bf16 %v568_v38, %v567_v42 }
 0x51b   :  { %2800 = vmatpush3.bf16.xpose.msk.msra.mxu0 %vm3190_vm3, %v2798_v37 }
 0x51c   :  { %2805 = vmatprep.subr.bf16.mxu0 %v2950_v11 }
 0x522   :  { %2673 = vmatmul.mubr.msk.f32.vlgmr.msra.gmra.mrb[8].mxu0 %vm465_vm1, %v3251_v45 }
 0x523   :  { %2696 = vmatprep.mubr.msk.f32.mxu0 %vm2951_vm2, %v2952_v12 }
 0x526   :  { %1561 = vrot.lane.b32.xlu1 %v3097_v34, %s2954_s8 }
 0x52c   :  { %1332 = vrot.lane.b32.xlu0 %v3095_v33, %s2954_s8 }
 0x54a   :  { %1299 = vxpose.xlu0.b32.start.end [1/1] (short) (narrow) %v1297_v46, 16 }
 0x54f   :  { %1528 = vxpose.xlu1.b32.start.end [1/1] (short) (narrow) %v1526_v43, 16 }
 0x59e   :  { %v995_v13 = vpop.xlane.xlu1 %994 }
 0x59f   :  { %2873 = vrcp.f32 %v995_v13  ;;  %v992_v49 = vpop.xlane.xlu0 %991 }
 0x5a0   :  { %2875 = vrcp.f32 %v992_v49 }
 0x5a2   :  { %v1210_v50 = vpop.xlane.xlu1 %1209 }
 0x5a3   :  { %2877 = vrcp.f32 %v1210_v50  ;;  %v1207_v53 = vpop.xlane.xlu0 %1206 }
 0x5a4   :  { %2879 = vrcp.f32 %v1207_v53 }
 0x5a6   :  { %v1562_v52 = vpop.permute.xlu1 %1561 }
 0x5a7   :  { %v1333_v61 = vpop.permute.xlu0 %1332 }
 0x5a9   :  { %v2874_v54 = vpop.eup %2873 }
 0x5aa   :  { %v2876_v55 = vpop.eup %2875  ;;  %v999_v56 = vmul.f32 %v2874_v54, %v2862_v22 }
 0x5ab   :  { %v998_v34 = vmul.f32 %v2876_v55, %v2864_v23 }
 0x5ad   :  { %v2878_v57 = vpop.eup %2877  ;;  %v2806_v58 = vpack.c.bf16 %v999_v56, %v998_v34 }
 0x5ae   :  { %v2880_v33 = vpop.eup %2879  ;;  %v1214_v59 = vmul.f32 %v2878_v57, %v2866_v26 }
 0x5af   :  { %v1213_v60 = vmul.f32 %v2880_v33, %v2868_v28  ;;  %2808 = vmatpush3.bf16.xpose.msk.msra.mxu0 %vm3190_vm3, %v2806_v58 }
 0x5b0   :  { %2711 = vmatprep.subr.mxu0 %v1333_v61 }
 0x5b1   :  { %v2810_v51 = vpack.c.bf16 %v1214_v59, %v1213_v60 }
 0x5b3   :  { %2812 = vmatpush3.bf16.xpose.msk.msra.mxu1 %vm3190_vm3, %v2810_v51 }
 0x5b4   :  { %2723 = vmatprep.subr.mxu1 %v1562_v52 }
 0x5b6   :  { %2697 = vmatmul.mubr.msk.f32.vlgmr.msra.gmra.mrb[10].mxu0 %vm465_vm1, %v3266_v62 }
 0x5b7   :  { %2712 = vmatpush3.msra.mxu0 %v1333_v61 }
 0x5b8   :  { %2813 = vmatprep.subr.bf16.mxu0 %v2950_v11 }
 0x5ba   :  { %2709 = vmatmul.mubr.msk.f32.vlgmr.msra.gmra.mrb[14].mxu1 %vm465_vm1, %v3271_v63 }
 0x5bb   :  { %2724 = vmatpush3.msra.mxu1 %v1562_v52 }
 0x5bc   :  { %2817 = vmatprep.subr.bf16.mxu1 %v2950_v11 }
 0x5ca   :  { %v1315_v0 = vpop.trf.xlu0 }
 0x5cb   :  { %2713 = vmatprep.mubr.msk.f32.mxu0 %vm465_vm1, %v1315_v0 }
 0x5ce   :  { %v1316_v1 = vpop.trf.xlu0 }
 0x5cf   :  { %v1544_v2 = vpop.trf.xlu1  ;;  %2714 = vmatmul.mubr.msk.f32.vlgmr.msra.gmra.mrb[12].mxu0 %vm465_vm1, %v1316_v1 }
 0x5d0   :  { %2725 = vmatprep.mubr.msk.f32.mxu1 %vm465_vm1, %v1544_v2  ;;  %2720 = vmatprep.mubr.msk.f32.mxu0 %vm2951_vm2, %v2952_v12 }
 0x5d3   :  { %v1545_v3 = vpop.trf.xlu1 }
 0x5d4   :  { %2726 = vmatmul.mubr.msk.f32.vlgmr.msra.gmra.mrb[16].mxu1 %vm465_vm1, %v1545_v3 }
 0x5d5   :  { %2732 = vmatprep.mubr.msk.f32.mxu1 %vm2951_vm2, %v2952_v12 }
 0x5f5   :  { %v644_v27 = vpop.f32.mrb[8].mxu0 }
 0x5f6   :  { %649 = vst.msk [vmem:[#allocation2] sm:$0xff] %vm648_vm4, %v644_v27  ;;  %v2674_v4 = vpop.f32.mrb[9].mxu0 }
 0x689   :  { %v1075_v5 = vpop.f32.mrb[10].mxu0 }
 0x68a   :  { %1079 = vst.msk [vmem:[#allocation2 + $0x10] sm:$0xff] %vm648_vm4, %v1075_v5  ;;  %v2698_v6 = vpop.f32.mrb[11].mxu0 }
 0x68d   :  { %v1290_v7 = vpop.f32.mrb[14].mxu1 }
 0x68e   :  { %1294 = vst.msk [vmem:[#allocation2 + $0x18] sm:$0xff] %vm648_vm4, %v1290_v7  ;;  %v2710_v8 = vpop.f32.mrb[15].mxu1 }
 0x6a2   :  { %v2715_v9 = vpop.f32.mrb[12].mxu0 }
 0x6a3   :  { %v1407_v10 = vpop.f32.mrb[13].mxu0  ;;  %v1419_v14 = vsel %vm465_vm1, %v2715_v9, -inf }
 0x6a4   :  { %1420 = vmax.xlane.f32.xlu1 %v1419_v14  ;;  %v1416_v30 = vsel %vm465_vm1, %v1407_v10, -inf }
 0x6a5   :  { %1417 = vmax.xlane.f32.xlu0 %v1416_v30 }
 0x6a7   :  { %v2727_v15 = vpop.f32.mrb[16].mxu1 }
 0x6a8   :  { %v1636_v18 = vpop.f32.mrb[17].mxu1  ;;  %v1648_v20 = vsel %vm465_vm1, %v2727_v15, -inf }
 0x6a9   :  { %v1645_v19 = vsel %vm465_vm1, %v1636_v18, -inf }
 0x6aa   :  { %1646 = vmax.xlane.f32.xlu0 %v1645_v19 }
 0x6ae   :  { %1649 = vmax.xlane.f32.xlu0 %v1648_v20 }
 0x6b5   :  { %1753 = vrot.lane.b32.xlu1 %v3170_v17, %s2953_s5 }
 0x6b9   :  { %1438 = vrot.lane.b32.xlu1 %v3251_v45, %s2954_s8 }
 0x6bd   :  { %1667 = vrot.lane.b32.xlu1 %v3200_v40, %s2954_s8 }
 0x6c4   :  { %1981 = vrot.lane.b32.xlu0 %v3168_v16, %s2953_s5 }
 0x731   :  { %v1421_v21 = vpop.xlane.xlu1 %1420 }
 0x732   :  { %v1423_v22 = vsub.f32 %v2715_v9, %v1421_v21  ;;  %v1418_v23 = vpop.xlane.xlu0 %1417 }
 0x733   :  { %v1422_v24 = vsub.f32 %v1407_v10, %v1418_v23 }
 0x734   :  { %v1426_v25 = vmul.f32 1.442695, %v1423_v22 }
 0x735   :  { %v1424_v26 = vmul.f32 1.442695, %v1422_v24  ;;  %v1754_v46 = vpop.permute.xlu1 %1753 }
 0x736   :  { %2881 = vpow2.f32 %v1426_v25 }
 0x737   :  { %2883 = vpow2.f32 %v1424_v26  ;;  %v1647_v28 = vpop.xlane.xlu0 %1646 }
 0x738   :  { %v1651_v29 = vsub.f32 %v1636_v18, %v1647_v28 }
 0x739   :  { %v1439_v48 = vpop.permute.xlu1 %1438 }
 0x73a   :  { %v1653_v17 = vmul.f32 1.442695, %v1651_v29 }
 0x73b   :  { %v1650_v32 = vpop.xlane.xlu0 %1649 }
 0x73c   :  { %2885 = vpow2.f32 %v1653_v17  ;;  %v1652_v35 = vsub.f32 %v2727_v15, %v1650_v32 }
 0x73d   :  { %v1668_v13 = vpop.permute.xlu1 %1667 }
 0x73e   :  { %v1655_v39 = vmul.f32 1.442695, %v1652_v35 }
 0x73f   :  { %v1982_v47 = vpop.permute.xlu0 %1981 }
 0x740   :  { %v2882_v38 = vpop.eup %2881  ;;  %2887 = vpow2.f32 %v1655_v39 }
 0x741   :  { %v2884_v40 = vpop.eup %2883  ;;  %v1431_v16 = vsel %vm465_vm1, %v2882_v38, 0.0 }
 0x742   :  { %1432 = vadd.xlane.f32.xlu0 %v1431_v16  ;;  %v1428_v42 = vsel %vm465_vm1, %v2884_v40, 0.0 }
 0x743   :  { %1429 = vadd.xlane.f32.xlu1 %v1428_v42 }
 0x746   :  { %v2886_v43 = vpop.eup %2885 }
 0x747   :  { %v1657_v37 = vsel %vm465_vm1, %v2886_v43, 0.0 }
 0x748   :  { %1658 = vadd.xlane.f32.xlu1 %v1657_v37 }
 0x74a   :  { %v2888_v44 = vpop.eup %2887 }
 0x74b   :  { %v1660_v45 = vsel %vm465_vm1, %v2888_v44, 0.0 }
 0x74c   :  { %1661 = vadd.xlane.f32.xlu0 %v1660_v45 }
 0x759   :  { %2017 = vrot.lane.b32.xlu1 %v3203_v41, %s2954_s8 }
 0x762   :  { %1789 = vrot.lane.b32.xlu0 %v3195_v36, %s2954_s8 }
 0x780   :  { %1756 = vxpose.xlu0.b32.start.end [1/1] (short) (narrow) %v1754_v46, 16 }
 0x782   :  { %1984 = vxpose.xlu1.b32.start.end [1/1] (short) (narrow) %v1982_v47, 16 }
 0x7cf   :  { %v1433_v49 = vpop.xlane.xlu0 %1432 }
 0x7d0   :  { %2889 = vrcp.f32 %v1433_v49  ;;  %v1430_v50 = vpop.xlane.xlu1 %1429 }
 0x7d1   :  { %2891 = vrcp.f32 %v1430_v50 }
 0x7d5   :  { %v1659_v53 = vpop.xlane.xlu1 %1658 }
 0x7d6   :  { %2893 = vrcp.f32 %v1659_v53 }
 0x7d9   :  { %v1662_v54 = vpop.xlane.xlu0 %1661  ;;  %v2018_v51 = vpop.permute.xlu1 %2017 }
 0x7da   :  { %v2890_v55 = vpop.eup %2889  ;;  %2895 = vrcp.f32 %v1662_v54 }
 0x7db   :  { %v2892_v56 = vpop.eup %2891  ;;  %v1437_v41 = vmul.f32 %v2890_v55, %v2882_v38 }
 0x7dc   :  { %v1436_v34 = vmul.f32 %v2892_v56, %v2884_v40 }
 0x7dd   :  { %v1790_v36 = vpop.permute.xlu0 %1789 }
 0x7de   :  { %v2814_v57 = vpack.c.bf16 %v1437_v41, %v1436_v34 }
 0x7e0   :  { %2816 = vmatpush3.bf16.xpose.msk.msra.mxu0 %vm3190_vm3, %v2814_v57  ;;  %v2894_v58 = vpop.eup %2893 }
 0x7e1   :  { %2735 = vmatprep.subr.mxu0 %v1790_v36  ;;  %v1665_v59 = vmul.f32 %v2894_v58, %v2886_v43 }
 0x7e4   :  { %v2896_v33 = vpop.eup %2895 }
 0x7e5   :  { %v1666_v60 = vmul.f32 %v2896_v33, %v2888_v44 }
 0x7e7   :  { %2721 = vmatmul.mubr.msk.f32.vlgmr.msra.gmra.mrb[14].mxu0 %vm465_vm1, %v1439_v48  ;;  %v2818_v61 = vpack.c.bf16 %v1666_v60, %v1665_v59  ;;  %v2216_v59 = vld [vmem:[%s3472_s10] sm:$0xff] }
 0x7e8   :  { %2736 = vmatpush3.msra.mxu0 %v1790_v36 }
 0x7e9   :  { %2820 = vmatpush3.bf16.xpose.msk.msra.mxu1 %vm3190_vm3, %v2818_v61  ;;  %2821 = vmatprep.subr.bf16.mxu0 %v2950_v11  ;;  %v2208_v61 = vld [vmem:[%s3471_s9] sm:$0xff] }
 0x7ea   :  { %2747 = vmatprep.subr.mxu1 %v2018_v51 }
 0x7f0   :  { %2733 = vmatmul.mubr.msk.f32.vlgmr.msra.gmra.mrb[18].mxu1 %vm465_vm1, %v1668_v13 }
 0x7f1   :  { %2748 = vmatpush3.msra.mxu1 %v2018_v51 }
 0x7f2   :  { %2825 = vmatprep.subr.bf16.mxu1 %v2950_v11 }
 0x800   :  { %v1772_v52 = vpop.trf.xlu0 }
 0x801   :  { %2737 = vmatprep.mubr.msk.f32.mxu0 %vm465_vm1, %v1772_v52  ;;  %v2217_v52 = vld [vmem:[%s3472_s10 + $0x8] sm:$0xff] }
 0x802   :  { %v2000_v0 = vpop.trf.xlu1 }
 0x803   :  { %2749 = vmatprep.mubr.msk.f32.mxu1 %vm465_vm1, %v2000_v0  ;;  %v2219_v0 = vld [vmem:[%s3472_s10 + $0x18] sm:$0xff] }
 0x804   :  { %v1773_v1 = vpop.trf.xlu0 }
 0x805   :  { %2738 = vmatmul.mubr.msk.f32.vlgmr.msra.gmra.mrb[16].mxu0 %vm465_vm1, %v1773_v1 }
 0x806   :  { %v2001_v2 = vpop.trf.xlu1  ;;  %2744 = vmatprep.mubr.msk.f32.mxu0 %vm2951_vm2, %v2952_v12 }
 0x807   :  { %2750 = vmatmul.mubr.msk.f32.vlgmr.msra.gmra.mrb[20].mxu1 %vm465_vm1, %v2001_v2 }
 0x808   :  { %2756 = vmatprep.mubr.msk.f32.mxu1 %vm2951_vm2, %v2952_v12 }
 0x8ba   :  { %v1514_v3 = vpop.f32.mrb[14].mxu0 }
 0x8bb   :  { %v2722_v11 = vpop.f32.mrb[15].mxu0 }
 0x8c3   :  { %v1743_v27 = vpop.f32.mrb[18].mxu1 }
 0x8c4   :  { %v2734_v4 = vpop.f32.mrb[19].mxu1 }
 0x8c5   :  { %v2209_v4 = vld [vmem:[%s3471_s9 + $0x8] sm:$0xff] }
 0x8d8   :  { %v2739_v5 = vpop.f32.mrb[16].mxu0 }
 0x8d9   :  { %v1864_v6 = vpop.f32.mrb[17].mxu0  ;;  %v1876_v7 = vsel %vm465_vm1, %v2739_v5, -inf }
 0x8da   :  { %1877 = vmax.xlane.f32.xlu1 %v1876_v7  ;;  %v2751_v8 = vpop.f32.mrb[20].mxu1  ;;  %v1873_v9 = vsel %vm465_vm1, %v1864_v6, -inf }
 0x8db   :  { %1874 = vmax.xlane.f32.xlu0 %v1873_v9  ;;  %v2092_v10 = vpop.f32.mrb[21].mxu1  ;;  %v2104_v30 = vsel %vm465_vm1, %v2751_v8, -inf }
 0x8dc   :  { %v2101_v14 = vsel %vm465_vm1, %v2092_v10, -inf }
 0x8df   :  { %2102 = vmax.xlane.f32.xlu0 %v2101_v14 }
 0x8e3   :  { %2105 = vmax.xlane.f32.xlu0 %v2104_v30 }
 0x967   :  { %v1878_v12 = vpop.xlane.xlu1 %1877 }
 0x968   :  { %v1880_v15 = vsub.f32 %v2739_v5, %v1878_v12  ;;  %v1875_v18 = vpop.xlane.xlu0 %1874  ;;  %v2210_v5 = vld [vmem:[%s3471_s9 + $0x10] sm:$0xff]  ;;  %v2921_v12 = vld [vmem:[%s3462_s0 + $0x8] sm:$0xff] }
 0x969   :  { %v1879_v19 = vsub.f32 %v1864_v6, %v1875_v18  ;;  %v2211_v6 = vld [vmem:[%s3471_s9 + $0x18] sm:$0xff] }
 0x96a   :  { %v1883_v20 = vmul.f32 1.442695, %v1880_v15 }
 0x96b   :  { %v1881_v21 = vmul.f32 1.442695, %v1879_v19  ;;  %v2922_v19 = vld [vmem:[%s3462_s0] sm:$0xff] }
 0x96c   :  { %2897 = vpow2.f32 %v1883_v20  ;;  %v2103_v22 = vpop.xlane.xlu0 %2102 }
 0x96d   :  { %2899 = vpow2.f32 %v1881_v21  ;;  %v2107_v23 = vsub.f32 %v2092_v10, %v2103_v22 }
 0x96f   :  { %v2109_v24 = vmul.f32 1.442695, %v2107_v23 }
 0x970   :  { %v2106_v25 = vpop.xlane.xlu0 %2105 }
 0x971   :  { %2901 = vpow2.f32 %v2109_v24  ;;  %v2108_v26 = vsub.f32 %v2751_v8, %v2106_v25 }
 0x973   :  { %v2111_v28 = vmul.f32 1.442695, %v2108_v26 }
 0x975   :  { %2903 = vpow2.f32 %v2111_v28 }
 0x976   :  { %v2898_v29 = vpop.eup %2897 }
 0x977   :  { %v2900_v17 = vpop.eup %2899  ;;  %v1888_v32 = vsel %vm465_vm1, %v2898_v29, 0.0 }
 0x978   :  { %1889 = vadd.xlane.f32.xlu0 %v1888_v32  ;;  %v1885_v35 = vsel %vm465_vm1, %v2900_v17, 0.0  ;;  %v2923_v32 = vld [vmem:[%s3462_s0 + $0x10] sm:$0xff] }
 0x979   :  { %1886 = vadd.xlane.f32.xlu1 %v1885_v35 }
 0x97b   :  { %v2902_v39 = vpop.eup %2901 }
 0x97c   :  { %v2113_v38 = vsel %vm465_vm1, %v2902_v39, 0.0 }
 0x97d   :  { %2114 = vadd.xlane.f32.xlu1 %v2113_v38  ;;  %v2924_v38 = vld [vmem:[%s3462_s0 + $0x18] sm:$0xff] }
 0x97f   :  { %v2904_v40 = vpop.eup %2903 }
 0x980   :  { %v2116_v16 = vsel %vm465_vm1, %v2904_v40, 0.0 }
 0x981   :  { %2117 = vadd.xlane.f32.xlu0 %v2116_v16 }
 0x98e   :  { %1895 = vrot.lane.b32.xlu1 %v3266_v62, %s2954_s8 }
 0x992   :  { %1519 = vrot.lane.b32.xlu1 %v1514_v3, %s2955_s19 }
 0x996   :  { %1748 = vrot.lane.b32.xlu1 %v1743_v27, %s2955_s19 }
 0x997   :  { %2123 = vrot.lane.b32.xlu0 %v3271_v63, %s2954_s8 }
 0xa05   :  { %v1890_v42 = vpop.xlane.xlu0 %1889 }
 0xa06   :  { %2905 = vrcp.f32 %v1890_v42  ;;  %v1887_v43 = vpop.xlane.xlu1 %1886 }
 0xa07   :  { %2907 = vrcp.f32 %v1887_v43 }
 0xa0a   :  { %v2115_v37 = vpop.xlane.xlu1 %2114 }
 0xa0b   :  { %2909 = vrcp.f32 %v2115_v37 }
 0xa0e   :  { %v1896_v44 = vpop.permute.xlu1 %1895  ;;  %v2118_v45 = vpop.xlane.xlu0 %2117 }
 0xa0f   :  { %2911 = vrcp.f32 %v2118_v45 }
 0xa10   :  { %v2906_v46 = vpop.eup %2905 }
 0xa11   :  { %v2908_v62 = vpop.eup %2907  ;;  %v1894_v47 = vmul.f32 %v2906_v46, %v2898_v29 }
 0xa12   :  { %v1893_v48 = vmul.f32 %v2908_v62, %v2900_v17  ;;  %v1520_v13 = vpop.permute.xlu1 %1519  ;;  %v2124_v36 = vpop.permute.xlu0 %2123 }
 0xa13   :  { %1523 = vst.msk [vmem:[#allocation2] sm:$0xff] %vm1522_vm5, %v1520_v13 }
 0xa14   :  { %v2822_v49 = vpack.c.bf16 %v1894_v47, %v1893_v48 }
 0xa15   :  { %v2910_v63 = vpop.eup %2909 }
 0xa16   :  { %v1749_v50 = vpop.permute.xlu1 %1748  ;;  %2824 = vmatpush3.bf16.xpose.msk.msra.mxu0 %vm3190_vm3, %v2822_v49  ;;  %v2121_v54 = vmul.f32 %v2910_v63, %v2902_v39 }
 0xa17   :  { %1751 = vst.msk [vmem:[#allocation2 + $0x8] sm:$0xff] %vm1522_vm5, %v1749_v50 }
 0xa19   :  { %v2912_v53 = vpop.eup %2911 }
 0xa1a   :  { %v2122_v55 = vmul.f32 %v2912_v53, %v2904_v40  ;;  %v2212_v41 = vld [vmem:[#allocation2] sm:$0xff] }
 0xa1c   :  { %v2826_v56 = vpack.c.bf16 %v2122_v55, %v2121_v54 }
 0xa1d   :  { %2745 = vmatmul.mubr.msk.f32.vlgmr.msra.gmra.mrb[18].mxu0 %vm465_vm1, %v1896_v44 }
 0xa1e   :  { %2828 = vmatpush3.bf16.xpose.msk.msra.mxu1 %vm3190_vm3, %v2826_v56  ;;  %v2213_v34 = vld [vmem:[#allocation2 + $0x8] sm:$0xff]  ;;  %2767 = vmatprep.mubr.msk.f32.mxu0 %vm77_vm0, %v2208_v61 }
 0xa1f   :  { %v2829_v57 = vpack.c.bf16 %v2213_v34, %v2212_v41 }
 0xa21   :  { %2830 = vmatprep.subr.bf16.mxu0 %v2829_v57 }
 0xa22   :  { %2832 = vmatpush3.bf16.msra.mxu0 %v2829_v57 }
 0xa25   :  { %2757 = vmatmul.mubr.msk.f32.vlgmr.msra.gmra.mrb[22].mxu1 %vm465_vm1, %v2124_v36 }
 0xaf0   :  { %v1971_v58 = vpop.f32.mrb[18].mxu0 }
 0xaf1   :  { %1976 = vrot.lane.b32.xlu0 %v1971_v58, %s2955_s19  ;;  %v2746_v33 = vpop.f32.mrb[19].mxu0 }
 0xaf5   :  { %2222 = vperm.xlu0 %2847, %v2216_v59  }
 0xaf8   :  { %v2199_v60 = vpop.f32.mrb[22].mxu1 }
 0xaf9   :  { %2232 = vperm.xlu0 %2847, %v2218_v31   ;;  %2204 = vrot.lane.b32.xlu1 %v2199_v60, %s2955_s19  ;;  %v2758_v51 = vpop.f32.mrb[23].mxu1 }
 0xafd   :  { %2227 = vperm.xlu1 %2848, %v2217_v52  }
 0xb01   :  { %2237 = vperm.xlu1 %2848, %v2219_v0  }
 0xb63   :  { %v1977_v1 = vpop.permute.xlu0 %1976 }
 0xb64   :  { %1979 = vst.msk [vmem:[#allocation2 + $0x10] sm:$0xff] %vm1522_vm5, %v1977_v1 }
 0xb6b   :  { %v2205_v2 = vpop.permute.xlu1 %2204  ;;  %v2214_v3 = vld [vmem:[#allocation2 + $0x10] sm:$0xff] }
 0xb6c   :  { %2207 = vst.msk [vmem:[#allocation2 + $0x18] sm:$0xff] %vm1522_vm5, %v2205_v2 }
 0xb73   :  { %v2215_v11 = vld [vmem:[#allocation2 + $0x18] sm:$0xff] }
 0xb74   :  { %v2833_v27 = vpack.c.bf16 %v2215_v11, %v2214_v3  ;;  %v2223_v8 = vpop.permute.xlu0 %2222 }
 0xb76   :  { %2834 = vmatprep.subr.bf16.mxu0 %v2833_v27 }
 0xb77   :  { %2836 = vmatpush3.bf16.msra.mxu0 %v2833_v27 }
 0xb78   :  { %v2233_v22 = vpop.permute.xlu0 %2232 }
 0xb7a   :  { %2768 = vmatmul.mubr.msk.f32.vlgmr.msra.gmra.mrb[20].mxu0 %vm77_vm0, %v2209_v4  ;;  %v2397_v4 = vld [vmem:[%s3473_s11] sm:$0xff] }
 0xb7b   :  { %2770 = vmatprep.mubr.msk.f32.mxu0 %vm77_vm0, %v2210_v5 }
 0xb7c   :  { %v2228_v7 = vpop.permute.xlu1 %2227 }
 0xb7e   :  { %2771 = vmatmul.mubr.msk.f32.gmra.mrb[22].mxu0 %vm77_vm0, %v2211_v6 }
 0xb80   :  { %v2238_v18 = vpop.permute.xlu1 %2237 }
 0xc4d   :  { %v2769_v9 = vpop.f32.mrb[20].mxu0 }
 0xc4e   :  { %v2324_v10 = vadd.f32 %v2769_v9, %v2228_v7  ;;  %v2318_v14 = vpop.f32.mrb[21].mxu0  ;;  %v2398_v7 = vld [vmem:[%s3473_s11 + $0x8] sm:$0xff] }
 0xc4f   :  { %v2319_v30 = vadd.f32 %v2318_v14, %v2223_v8 }
 0xc50   :  { %v3381_v15 = vadd.f32 %v2921_v12, %v2324_v10  ;;  %v2405_v12 = vld [vmem:[%s3474_s12] sm:$0xff] }
 0xc51   :  { %v3386_v20 = vadd.f32 %v2922_v19, %v2319_v30  ;;  %v2772_v21 = vpop.f32.mrb[22].mxu0 }
 0xc52   :  { %v2334_v23 = vadd.f32 %v2772_v21, %v2238_v18  ;;  %v2328_v24 = vpop.f32.mrb[23].mxu0  ;;  %v2344_v25 = vsel %vm77_vm0, %v3381_v15, 0.0  ;;  %v2354_v17 = vmul.f32 %v3381_v15, %v3381_v15  ;;  %v2399_v21 = vld [vmem:[%s3473_s11 + $0x10] sm:$0xff] }
 0xc53   :  { %v2329_v26 = vadd.f32 %v2328_v24, %v2233_v22  ;;  %2345 = vadd.xlane.f32.xlu1 %v2344_v25  ;;  %v2341_v28 = vsel %vm77_vm0, %v3386_v20, 0.0  ;;  %v2353_v29 = vmul.f32 %v3386_v20, %v3386_v20 }
 0xc54   :  { %2342 = vadd.xlane.f32.xlu0 %v2341_v28  ;;  %v3405_v40 = vadd.f32 %v2924_v38, %v2334_v23  ;;  %v2360_v16 = vsel %vm77_vm0, %v2354_v17, 0.0  ;;  %v2400_v23 = vld [vmem:[%s3473_s11 + $0x18] sm:$0xff] }
 0xc55   :  { %v3399_v35 = vadd.f32 %v2923_v32, %v2329_v26  ;;  %v2357_v39 = vsel %vm77_vm0, %v2353_v29, 0.0  ;;  %v2407_v26 = vld [vmem:[%s3474_s12 + $0x10] sm:$0xff]  ;;  %v2406_v32 = vld [vmem:[%s3474_s12 + $0x8] sm:$0xff] }
 0xc56   :  { %v2350_v37 = vsel %vm77_vm0, %v3405_v40, 0.0  ;;  %v2356_v45 = vmul.f32 %v3405_v40, %v3405_v40 }
 0xc57   :  { %2358 = vadd.xlane.f32.xlu1 %v2357_v39  ;;  %v2355_v42 = vmul.f32 %v3399_v35, %v3399_v35  ;;  %v2347_v44 = vsel %vm77_vm0, %v3399_v35, 0.0 }
 0xc58   :  { %2361 = vadd.xlane.f32.xlu0 %v2360_v16  ;;  %v2366_v46 = vsel %vm77_vm0, %v2356_v45, 0.0 }
 0xc59   :  { %v2363_v43 = vsel %vm77_vm0, %v2355_v42, 0.0  ;;  %v2408_v42 = vld [vmem:[%s3474_s12 + $0x18] sm:$0xff]  ;;  %s2956_s12 = smov [#allocation3]  }
 0xc5a   :  { %s2474_s28 = sshll.u32 %s2956_s12, 4  ;;  %s2475_s28 = int_to_ptr.vmem [resolvable:$true] %s2474_s28 }
 0xc5b   :  { %2364 = vadd.xlane.f32.xlu1 %v2363_v43  ;;  %s2925_s7 = scalar_lea.vmem %s2475_s28, 512  ;;  %p2930_p1 = scmp.lt.s32.totalorder %s2475_s28, %s2475_s28 }
 0xc5c   :  { %2351 = vadd.xlane.f32.xlu0 %v2350_v37  ;;  %p2926_p0 = scmp.ne.s32.totalorder %s2475_s28, %s2925_s7  ;;  %p2931_p2 = scmp.lt.s32.totalorder %s2925_s7, %s2925_s7 }
 0xc5e   :  { %p2932_p3 = por %p2931_p2, %p2930_p1 }
 0xc60   :  { %2348 = vadd.xlane.f32.xlu0 %v2347_v44  ;;  %p2933_p4 = pnand %p2932_p3, %p2926_p0 }
 0xc64   :  { %2367 = vadd.xlane.f32.xlu0 %v2366_v46 }
 0xce0   :  { %v2346_v62 = vpop.xlane.xlu1 %2345 }
 0xce1   :  { %v2343_v47 = vpop.xlane.xlu0 %2342  ;;  %v2370_v48 = vmul.f32 0.03125, %v2346_v62 }
 0xce2   :  { %v2369_v13 = vmul.f32 0.03125, %v2343_v47 }
 0xce3   :  { %v2378_v54 = vmul.f32 %v2370_v48, %v2370_v48 }
 0xce4   :  { %v2377_v49 = vmul.f32 %v2369_v13, %v2369_v13  ;;  %v2359_v50 = vpop.xlane.xlu1 %2358 }
 0xce5   :  { %v2373_v63 = vmul.f32 0.03125, %v2359_v50  ;;  %v2362_v53 = vpop.xlane.xlu0 %2361 }
 0xce6   :  { %v2374_v55 = vmul.f32 0.03125, %v2362_v53 }
 0xce7   :  { %v2381_v56 = vsub.f32 %v2373_v63, %v2377_v49 }
 0xce8   :  { %v2382_v41 = vsub.f32 %v2374_v55, %v2378_v54  ;;  %v2365_v59 = vpop.xlane.xlu1 %2364 }
 0xce9   :  { %v2385_v34 = vmax.f32 %v2381_v56, 0.0  ;;  %v2352_v57 = vpop.xlane.xlu0 %2351  ;;  %v2375_v51 = vmul.f32 0.03125, %v2365_v59 }
 0xcea   :  { %v2386_v36 = vmax.f32 %v2382_v41, 0.0  ;;  %v2372_v60 = vmul.f32 0.03125, %v2352_v57 }
 0xceb   :  { %v2389_v58 = vadd.f32 1e-05, %v2385_v34 }
 0xcec   :  { %v2390_v33 = vadd.f32 1e-05, %v2386_v36  ;;  %v2380_v1 = vmul.f32 %v2372_v60, %v2372_v60 }
 0xced   :  { %2913 = vrsqrt.f32 %v2389_v58  ;;  %v2349_v31 = vpop.xlane.xlu0 %2348 }
 0xcee   :  { %2915 = vrsqrt.f32 %v2390_v33  ;;  %v2371_v61 = vmul.f32 0.03125, %v2349_v31 }
 0xcf0   :  { %v2379_v52 = vmul.f32 %v2371_v61, %v2371_v61 }
 0xcf1   :  { %v2368_v0 = vpop.xlane.xlu0 %2367 }
 0xcf2   :  { %v2383_v2 = vsub.f32 %v2375_v51, %v2379_v52  ;;  %v2376_v3 = vmul.f32 0.03125, %v2368_v0 }
 0xcf4   :  { %v2387_v11 = vmax.f32 %v2383_v2, 0.0  ;;  %v2384_v27 = vsub.f32 %v2376_v3, %v2380_v1 }
 0xcf6   :  { %v2391_v5 = vadd.f32 1e-05, %v2387_v11  ;;  %v2388_v6 = vmax.f32 %v2384_v27, 0.0 }
 0xcf7   :  { %v2914_v8 = vpop.eup %2913 }
 0xcf8   :  { %v2916_v9 = vpop.eup %2915  ;;  %2917 = vrsqrt.f32 %v2391_v5  ;;  %v2392_v10 = vadd.f32 1e-05, %v2388_v6  ;;  %v2401_v14 = vmul.f32 %v2914_v8, %v2397_v4 }
 0xcf9   :  { %v2402_v30 = vmul.f32 %v2916_v9, %v2398_v7 }
 0xcfa   :  { %2919 = vrsqrt.f32 %v2392_v10  ;;  %2419 = vperm.xlu1 %2848, %v2401_v14   ;;  %v2409_v18 = vmul.f32 %v2401_v14, %v2369_v13 }
 0xcfb   :  { %2424 = vperm.xlu0 %2847, %v2402_v30   ;;  %v2410_v17 = vmul.f32 %v2402_v30, %v2370_v48 }
 0xcfc   :  { %v2413_v19 = vsub.f32 %v2405_v12, %v2409_v18 }
 0xcfd   :  { %v2414_v38 = vsub.f32 %v2406_v32, %v2410_v17 }
 0xcff   :  { %2443 = vperm.xlu0 %2847, %v2413_v19  }
 0xd02   :  { %v2918_v22 = vpop.eup %2917 }
 0xd03   :  { %v2403_v24 = vmul.f32 %v2918_v22, %v2399_v21 }
 0xd04   :  { %v2920_v25 = vpop.eup %2919 }
 0xd05   :  { %v2411_v28 = vmul.f32 %v2403_v24, %v2371_v61  ;;  %v2404_v29 = vmul.f32 %v2920_v25, %v2400_v23 }
 0xd07   :  { %2434 = vperm.xlu1 %2848, %v2404_v29   ;;  %v2415_v39 = vsub.f32 %v2407_v26, %v2411_v28  ;;  %v2412_v16 = vmul.f32 %v2404_v29, %v2372_v60 }
 0xd09   :  { %2453 = vperm.xlu0 %2847, %v2415_v39   ;;  %v2416_v43 = vsub.f32 %v2408_v42, %v2412_v16 }
 0xd0b   :  { %2448 = vperm.xlu1 %2848, %v2414_v38  }
 0xd0f   :  { %2429 = vperm.xlu1 %2848, %v2403_v24  }
 0xd13   :  { %2458 = vperm.xlu1 %2848, %v2416_v43  }
 0xd79   :  { %v2420_v37 = vpop.permute.xlu1 %2419 }
 0xd7a   :  { %v2425_v44 = vpop.permute.xlu0 %2424  ;;  %v2437_v45 = vmul.f32 %v2420_v37, %v3386_v20 }
 0xd7b   :  { %v2438_v48 = vmul.f32 %v2425_v44, %v3381_v15 }
 0xd7e   :  { %v2444_v46 = vpop.permute.xlu0 %2443 }
 0xd7f   :  { %v2461_v62 = vadd.f32 %v2444_v46, %v2437_v45 }
 0xd81   :  { %2465 = vst.msk [vmem:[#allocation3] sm:$0xff] %vm77_vm0, %v2461_v62 }
 0xd86   :  { %v2435_v47 = vpop.permute.xlu1 %2434 }
 0xd87   :  { %v2440_v54 = vmul.f32 %v2435_v47, %v3405_v40 }
 0xd88   :  { %v2454_v53 = vpop.permute.xlu0 %2453 }
 0xd8a   :  { %v2449_v13 = vpop.permute.xlu1 %2448 }
 0xd8b   :  { %v2462_v49 = vadd.f32 %v2449_v13, %v2438_v48 }
 0xd8d   :  { %2466 = vst.msk [vmem:[#allocation3 + $0x8] sm:$0xff] %vm77_vm0, %v2462_v49 }
 0xd8e   :  { %v2430_v50 = vpop.permute.xlu1 %2429 }
 0xd8f   :  { %v2439_v63 = vmul.f32 %v2430_v50, %v3399_v35 }
 0xd91   :  { %v2463_v20 = vadd.f32 %v2454_v53, %v2439_v63 }
 0xd92   :  { %v2459_v55 = vpop.permute.xlu1 %2458 }
 0xd93   :  { %2467 = vst.msk [vmem:[#allocation3 + $0x10] sm:$0xff] %vm77_vm0, %v2463_v20  ;;  %v2464_v56 = vadd.f32 %v2459_v55, %v2440_v54 }
 0xd95   :  { %2468 = vst.msk [vmem:[#allocation3 + $0x18] sm:$0xff] %vm77_vm0, %v2464_v56 }
 0xd96   :  { %2936 = shalt.err (!%p2933_p4)
}
 0xd97   :  { %s2937_s29 = scalar_lea.hbm %s3475_s13, 512 }
 0xd98   :  { %p2938_p5 = scmp.ne.s32.totalorder %s3475_s13, %s2937_s29  ;;  %p2941_p6 = scmp.lt.u32.totalorder %s2937_s29, %s3475_s13 }
 0xd9a   :  { %p2943_p7 = pnand %p2941_p6, %p2938_p5 }
 0xd9c   :  { %2946 = shalt.err (!%p2943_p7)
}
 0xd9d   :  { %s2957_s9 = smov 128   ;;  %s2958_s16 = smov 8  }
 0xd9e   :  { %2480 = dma.vmem_to_hbm [thread:$0]  %s2475_s28, 512, %s3475_s13, [#allocation4], %s2957_s9, %s2957_s9, %s2958_s16  }
 0xd9f   :  { %2947 = dma.done.wait [#allocation4], 512  }
 0xda0   :  { %2948 = vsyncadd [#allocation4], 4294966784 }
 0xda1   :  { %2484 = vsyncpa [#allocation4], 1 }

</bundles_post_ra>
